<compile_context>
chip_gen: v5e
topology: v5e:2x2
jax: 0.10.0
libtpu: 0.0.40
codegen_flags: <defaults>
</compile_context>

<pallas_src>
import jax
import jax.numpy as jnp
from jax.experimental import pallas as pl


# ----------------------------- Pallas kernels -------------------------------

def _conv_relu_pool_kernel(a00_ref, a01_ref, a10_ref, a11_ref,
                           w_ref, b_ref, o_ref):
    """Fused conv(+bias,+ReLU)+2x2 maxpool over four pool-tap patch matrices.

    Each a??_ref is (M, K) = (N*PH*PW, kh*kw*cin) im2col rows for one of the
    four positions inside the 2x2 pooling window.  bf16 MXU matmuls with f32
    accumulation; bias + ReLU fused; elementwise max implements the pool
    (ReLU and max commute, so relu-then-max == torch's pool(relu(conv)))."""
    w = w_ref[...].astype(jnp.bfloat16)
    bias = b_ref[...]                     # (1, cout), f32

    def tap(a_ref):
        acc = jnp.dot(a_ref[...].astype(jnp.bfloat16), w,
                      preferred_element_type=jnp.float32)
        return jnp.maximum(acc + bias, 0.0)

    o_ref[...] = jnp.maximum(jnp.maximum(tap(a00_ref), tap(a01_ref)),
                             jnp.maximum(tap(a10_ref), tap(a11_ref)))


def _matmul_bias_kernel(a_ref, b_ref, bias_ref, o_ref):
    """(M,K)@(K,N) + bias with bf16 MXU inputs and f32 accumulation."""
    acc = jnp.dot(a_ref[...].astype(jnp.bfloat16),
                  b_ref[...].astype(jnp.bfloat16),
                  preferred_element_type=jnp.float32)
    o_ref[...] = acc + bias_ref[...]


# ------------------------------ JAX glue ------------------------------------

def _pool_tap_patches(x, kh, kw, dy, dx):
    """im2col patches for the conv-output positions (2*ph+dy, 2*pw+dx).

    x: NHWC.  Returns ((N*PH*PW, kh*kw*C), (N, PH, PW)) where PH/PW are the
    post-2x2-maxpool spatial dims.  K-axis order is (kh, kw, cin), matching an
    HWIO weight reshaped to (kh*kw*cin, cout)."""
    N, H, W, C = x.shape
    OH, OW = H - kh + 1, W - kw + 1
    PH, PW = OH // 2, OW // 2
    cols = [x[:, dy + i: dy + i + 2 * PH: 2,
                 dx + j: dx + j + 2 * PW: 2, :]
            for i in range(kh) for j in range(kw)]
    patches = jnp.stack(cols, axis=3).reshape(N * PH * PW, kh * kw * C)
    return patches, (N, PH, PW)


def conv_relu_maxpool(x, w_hwio, bias):
    """'valid' conv (stride 1) + bias + ReLU + 2x2/s2 maxpool, one Pallas call.

    x: NHWC float32 -> pooled NHWC float32."""
    kh, kw, cin, cout = w_hwio.shape
    taps = []
    n = ph = pw = None
    for dy in (0, 1):
        for dx in (0, 1):
            p, (n, ph, pw) = _pool_tap_patches(x, kh, kw, dy, dx)
            taps.append(p)
    wmat = w_hwio.reshape(kh * kw * cin, cout).astype(jnp.float32)
    bias2d = bias.reshape(1, cout).astype(jnp.float32)
    m = taps[0].shape[0]
    out = pl.pallas_call(
        _conv_relu_pool_kernel,
        out_shape=jax.ShapeDtypeStruct((m, cout), jnp.float32),
    )(*taps, wmat, bias2d)
    return out.reshape(n, ph, pw, cout)


def linear(x, w, bias):
    """x:(M,K) @ w:(K,N) + bias, bias fused in the Pallas epilogue."""
    m, k = x.shape
    _, n = w.shape
    return pl.pallas_call(
        _matmul_bias_kernel,
        out_shape=jax.ShapeDtypeStruct((m, n), jnp.float32),
    )(x.astype(jnp.float32), w.astype(jnp.float32),
      bias.reshape(1, n).astype(jnp.float32))


# --------------------------- DNN_v1 forward ----------------------------------

def init_params(key):
    k1, k2, k3, k4, k5, k6 = jax.random.split(key, 6)
    return {
        # HWIO conv weights (== torch OIHW weight.transpose(2, 3, 1, 0))
        'conv1_w': 0.05 * jax.random.normal(k1, (5, 5, 1, 6), jnp.float32),
        'conv1_b': 0.05 * jax.random.normal(k2, (6,), jnp.float32),
        'conv2_w': 0.05 * jax.random.normal(k3, (5, 5, 6, 16), jnp.float32),
        'conv2_b': 0.05 * jax.random.normal(k4, (16,), jnp.float32),
        # (400, 10) == torch fc1.weight.T (rows in torch's (C, H, W) order)
        'fc_w': 0.05 * jax.random.normal(k5, (16 * 5 * 5, 10), jnp.float32),
        'fc_b': 0.05 * jax.random.normal(k6, (10,), jnp.float32),
    }


def dnn_v1_forward(x_nchw, params):
    # PyTorch NCHW -> NHWC at the boundary.
    x = jnp.transpose(x_nchw, (0, 2, 3, 1)).astype(jnp.float32)
    # conv1 + ReLU + pool, fused                         -> (N, 14, 14, 6)
    x = conv_relu_maxpool(x, params['conv1_w'], params['conv1_b'])
    # conv2 + ReLU + pool, fused                         -> (N, 5, 5, 16)
    x = conv_relu_maxpool(x, params['conv2_w'], params['conv2_b'])
    # flatten in PyTorch's NCHW view order (C, H, W)     -> (N, 400)
    n = x.shape[0]
    feat = jnp.transpose(x, (0, 3, 1, 2)).reshape(n, -1)
    # fc1 (bias fused in the matmul epilogue, no ReLU)   -> (N, 10)
    return linear(feat, params['fc_w'], params['fc_b'])


# ------------------------------------ main -----------------------------------

if __name__ == "__main__":
    key = jax.random.PRNGKey(0)
    k_in, k_par = jax.random.split(key)

    # Deterministic example input, PyTorch NCHW convention.
    # 32x32 spatial so the flatten is 16*5*5 = 400, as the module's fc1 expects.
    x = jax.random.normal(k_in, (2, 1, 32, 32), jnp.float32)
    params = init_params(k_par)

    logits = jax.jit(dnn_v1_forward)(x, params)
    logits = jax.block_until_ready(logits)
    assert logits.shape == (2, 10), logits.shape
    assert bool(jnp.all(jnp.isfinite(logits)))
    print("KERNEL_OK")
</pallas_src>

<mosaic_0001>
module attributes {stable_mosaic.version = 11 : i64} {
  func.func @_conv_relu_pool_kernel(%arg0: memref<392x25xf32, #tpu.memory_space<vmem>>, %arg1: memref<392x25xf32, #tpu.memory_space<vmem>>, %arg2: memref<392x25xf32, #tpu.memory_space<vmem>>, %arg3: memref<392x25xf32, #tpu.memory_space<vmem>>, %arg4: memref<25x6xf32, #tpu.memory_space<vmem>>, %arg5: memref<1x6xf32, #tpu.memory_space<vmem>>, %arg6: memref<392x6xf32, #tpu.memory_space<vmem>>) attributes {dimension_semantics = [], scalar_prefetch = 0 : i64, scratch_operands = 0 : i64, tpu.core_type = #tpu.core_type<tc>} {
    %c0 = arith.constant 0 : index
    %c0_0 = arith.constant 0 : index
    %0 = vector.load %arg4[%c0, %c0_0] : memref<25x6xf32, #tpu.memory_space<vmem>>, vector<25x6xf32>
    %1 = arith.truncf %0 : vector<25x6xf32> to vector<25x6xbf16>
    %c0_1 = arith.constant 0 : index
    %c0_2 = arith.constant 0 : index
    %2 = vector.load %arg5[%c0_1, %c0_2] : memref<1x6xf32, #tpu.memory_space<vmem>>, vector<1x6xf32>
    %c0_3 = arith.constant 0 : index
    %c0_4 = arith.constant 0 : index
    %3 = vector.load %arg0[%c0_3, %c0_4] : memref<392x25xf32, #tpu.memory_space<vmem>>, vector<392x25xf32>
    %4 = arith.truncf %3 : vector<392x25xf32> to vector<392x25xbf16>
    %cst = arith.constant dense<0.000000e+00> : vector<392x6xf32>
    %5 = tpu.matmul %4, %1, %cst {dimension_numbers = #tpu.dot_dimension_numbers<[1], [0], [0], [1], [0, 0, 1, 1], [], []>} : vector<392x25xbf16>, vector<25x6xbf16>, vector<392x6xf32> -> vector<392x6xf32>
    %6 = vector.broadcast %2 : vector<1x6xf32> to vector<392x6xf32>
    %7 = arith.addf %5, %6 : vector<392x6xf32>
    %cst_5 = arith.constant 0.000000e+00 : f32
    %8 = vector.broadcast %cst_5 : f32 to vector<392x6xf32>
    %9 = arith.maximumf %7, %8 : vector<392x6xf32>
    %c0_6 = arith.constant 0 : index
    %c0_7 = arith.constant 0 : index
    %10 = vector.load %arg1[%c0_6, %c0_7] : memref<392x25xf32, #tpu.memory_space<vmem>>, vector<392x25xf32>
    %11 = arith.truncf %10 : vector<392x25xf32> to vector<392x25xbf16>
    %cst_8 = arith.constant dense<0.000000e+00> : vector<392x6xf32>
    %12 = tpu.matmul %11, %1, %cst_8 {dimension_numbers = #tpu.dot_dimension_numbers<[1], [0], [0], [1], [0, 0, 1, 1], [], []>} : vector<392x25xbf16>, vector<25x6xbf16>, vector<392x6xf32> -> vector<392x6xf32>
    %13 = vector.broadcast %2 : vector<1x6xf32> to vector<392x6xf32>
    %14 = arith.addf %12, %13 : vector<392x6xf32>
    %cst_9 = arith.constant 0.000000e+00 : f32
    %15 = vector.broadcast %cst_9 : f32 to vector<392x6xf32>
    %16 = arith.maximumf %14, %15 : vector<392x6xf32>
    %17 = arith.maximumf %9, %16 : vector<392x6xf32>
    %c0_10 = arith.constant 0 : index
    %c0_11 = arith.constant 0 : index
    %18 = vector.load %arg2[%c0_10, %c0_11] : memref<392x25xf32, #tpu.memory_space<vmem>>, vector<392x25xf32>
    %19 = arith.truncf %18 : vector<392x25xf32> to vector<392x25xbf16>
    %cst_12 = arith.constant dense<0.000000e+00> : vector<392x6xf32>
    %20 = tpu.matmul %19, %1, %cst_12 {dimension_numbers = #tpu.dot_dimension_numbers<[1], [0], [0], [1], [0, 0, 1, 1], [], []>} : vector<392x25xbf16>, vector<25x6xbf16>, vector<392x6xf32> -> vector<392x6xf32>
    %21 = vector.broadcast %2 : vector<1x6xf32> to vector<392x6xf32>
    %22 = arith.addf %20, %21 : vector<392x6xf32>
    %cst_13 = arith.constant 0.000000e+00 : f32
    %23 = vector.broadcast %cst_13 : f32 to vector<392x6xf32>
    %24 = arith.maximumf %22, %23 : vector<392x6xf32>
    %c0_14 = arith.constant 0 : index
    %c0_15 = arith.constant 0 : index
    %25 = vector.load %arg3[%c0_14, %c0_15] : memref<392x25xf32, #tpu.memory_space<vmem>>, vector<392x25xf32>
    %26 = arith.truncf %25 : vector<392x25xf32> to vector<392x25xbf16>
    %cst_16 = arith.constant dense<0.000000e+00> : vector<392x6xf32>
    %27 = tpu.matmul %26, %1, %cst_16 {dimension_numbers = #tpu.dot_dimension_numbers<[1], [0], [0], [1], [0, 0, 1, 1], [], []>} : vector<392x25xbf16>, vector<25x6xbf16>, vector<392x6xf32> -> vector<392x6xf32>
    %28 = vector.broadcast %2 : vector<1x6xf32> to vector<392x6xf32>
    %29 = arith.addf %27, %28 : vector<392x6xf32>
    %cst_17 = arith.constant 0.000000e+00 : f32
    %30 = vector.broadcast %cst_17 : f32 to vector<392x6xf32>
    %31 = arith.maximumf %29, %30 : vector<392x6xf32>
    %32 = arith.maximumf %24, %31 : vector<392x6xf32>
    %33 = arith.maximumf %17, %32 : vector<392x6xf32>
    %c0_18 = arith.constant 0 : index
    %c0_19 = arith.constant 0 : index
    %34 = vector.load %arg6[%c0_18, %c0_19] : memref<392x6xf32, #tpu.memory_space<vmem>>, vector<392x6xf32>
    tpu.vector_store %arg6[%c0_18, %c0_19], %33 {strides = array<i32>} : memref<392x6xf32, #tpu.memory_space<vmem>>, vector<392x6xf32>,
    return
  }
}

module attributes {stable_mosaic.version = 11 : i64} {
  func.func @_conv_relu_pool_kernel(%arg0: memref<50x150xf32, #tpu.memory_space<vmem>>, %arg1: memref<50x150xf32, #tpu.memory_space<vmem>>, %arg2: memref<50x150xf32, #tpu.memory_space<vmem>>, %arg3: memref<50x150xf32, #tpu.memory_space<vmem>>, %arg4: memref<150x16xf32, #tpu.memory_space<vmem>>, %arg5: memref<1x16xf32, #tpu.memory_space<vmem>>, %arg6: memref<50x16xf32, #tpu.memory_space<vmem>>) attributes {dimension_semantics = [], scalar_prefetch = 0 : i64, scratch_operands = 0 : i64, tpu.core_type = #tpu.core_type<tc>} {
    %c0 = arith.constant 0 : index
    %c0_0 = arith.constant 0 : index
    %0 = vector.load %arg4[%c0, %c0_0] : memref<150x16xf32, #tpu.memory_space<vmem>>, vector<150x16xf32>
    %1 = arith.truncf %0 : vector<150x16xf32> to vector<150x16xbf16>
    %c0_1 = arith.constant 0 : index
    %c0_2 = arith.constant 0 : index
    %2 = vector.load %arg5[%c0_1, %c0_2] : memref<1x16xf32, #tpu.memory_space<vmem>>, vector<1x16xf32>
    %c0_3 = arith.constant 0 : index
    %c0_4 = arith.constant 0 : index
    %3 = vector.load %arg0[%c0_3, %c0_4] : memref<50x150xf32, #tpu.memory_space<vmem>>, vector<50x150xf32>
    %4 = arith.truncf %3 : vector<50x150xf32> to vector<50x150xbf16>
    %cst = arith.constant dense<0.000000e+00> : vector<50x16xf32>
    %5 = tpu.matmul %4, %1, %cst {dimension_numbers = #tpu.dot_dimension_numbers<[1], [0], [0], [1], [0, 0, 1, 1], [], []>} : vector<50x150xbf16>, vector<150x16xbf16>, vector<50x16xf32> -> vector<50x16xf32>
    %6 = vector.broadcast %2 : vector<1x16xf32> to vector<50x16xf32>
    %7 = arith.addf %5, %6 : vector<50x16xf32>
    %cst_5 = arith.constant 0.000000e+00 : f32
    %8 = vector.broadcast %cst_5 : f32 to vector<50x16xf32>
    %9 = arith.maximumf %7, %8 : vector<50x16xf32>
    %c0_6 = arith.constant 0 : index
    %c0_7 = arith.constant 0 : index
    %10 = vector.load %arg1[%c0_6, %c0_7] : memref<50x150xf32, #tpu.memory_space<vmem>>, vector<50x150xf32>
    %11 = arith.truncf %10 : vector<50x150xf32> to vector<50x150xbf16>
    %cst_8 = arith.constant dense<0.000000e+00> : vector<50x16xf32>
    %12 = tpu.matmul %11, %1, %cst_8 {dimension_numbers = #tpu.dot_dimension_numbers<[1], [0], [0], [1], [0, 0, 1, 1], [], []>} : vector<50x150xbf16>, vector<150x16xbf16>, vector<50x16xf32> -> vector<50x16xf32>
    %13 = vector.broadcast %2 : vector<1x16xf32> to vector<50x16xf32>
    %14 = arith.addf %12, %13 : vector<50x16xf32>
    %cst_9 = arith.constant 0.000000e+00 : f32
    %15 = vector.broadcast %cst_9 : f32 to vector<50x16xf32>
    %16 = arith.maximumf %14, %15 : vector<50x16xf32>
    %17 = arith.maximumf %9, %16 : vector<50x16xf32>
    %c0_10 = arith.constant 0 : index
    %c0_11 = arith.constant 0 : index
    %18 = vector.load %arg2[%c0_10, %c0_11] : memref<50x150xf32, #tpu.memory_space<vmem>>, vector<50x150xf32>
    %19 = arith.truncf %18 : vector<50x150xf32> to vector<50x150xbf16>
    %cst_12 = arith.constant dense<0.000000e+00> : vector<50x16xf32>
    %20 = tpu.matmul %19, %1, %cst_12 {dimension_numbers = #tpu.dot_dimension_numbers<[1], [0], [0], [1], [0, 0, 1, 1], [], []>} : vector<50x150xbf16>, vector<150x16xbf16>, vector<50x16xf32> -> vector<50x16xf32>
    %21 = vector.broadcast %2 : vector<1x16xf32> to vector<50x16xf32>
    %22 = arith.addf %20, %21 : vector<50x16xf32>
    %cst_13 = arith.constant 0.000000e+00 : f32
    %23 = vector.broadcast %cst_13 : f32 to vector<50x16xf32>
    %24 = arith.maximumf %22, %23 : vector<50x16xf32>
    %c0_14 = arith.constant 0 : index
    %c0_15 = arith.constant 0 : index
    %25 = vector.load %arg3[%c0_14, %c0_15] : memref<50x150xf32, #tpu.memory_space<vmem>>, vector<50x150xf32>
    %26 = arith.truncf %25 : vector<50x150xf32> to vector<50x150xbf16>
    %cst_16 = arith.constant dense<0.000000e+00> : vector<50x16xf32>
    %27 = tpu.matmul %26, %1, %cst_16 {dimension_numbers = #tpu.dot_dimension_numbers<[1], [0], [0], [1], [0, 0, 1, 1], [], []>} : vector<50x150xbf16>, vector<150x16xbf16>, vector<50x16xf32> -> vector<50x16xf32>
    %28 = vector.broadcast %2 : vector<1x16xf32> to vector<50x16xf32>
    %29 = arith.addf %27, %28 : vector<50x16xf32>
    %cst_17 = arith.constant 0.000000e+00 : f32
    %30 = vector.broadcast %cst_17 : f32 to vector<50x16xf32>
    %31 = arith.maximumf %29, %30 : vector<50x16xf32>
    %32 = arith.maximumf %24, %31 : vector<50x16xf32>
    %33 = arith.maximumf %17, %32 : vector<50x16xf32>
    %c0_18 = arith.constant 0 : index
    %c0_19 = arith.constant 0 : index
    %34 = vector.load %arg6[%c0_18, %c0_19] : memref<50x16xf32, #tpu.memory_space<vmem>>, vector<50x16xf32>
    tpu.vector_store %arg6[%c0_18, %c0_19], %33 {strides = array<i32>} : memref<50x16xf32, #tpu.memory_space<vmem>>, vector<50x16xf32>,
    return
  }
}

module attributes {stable_mosaic.version = 11 : i64} {
  func.func @_matmul_bias_kernel(%arg0: memref<2x400xf32, #tpu.memory_space<vmem>>, %arg1: memref<400x10xf32, #tpu.memory_space<vmem>>, %arg2: memref<1x10xf32, #tpu.memory_space<vmem>>, %arg3: memref<2x10xf32, #tpu.memory_space<vmem>>) attributes {dimension_semantics = [], scalar_prefetch = 0 : i64, scratch_operands = 0 : i64, tpu.core_type = #tpu.core_type<tc>} {
    %c0 = arith.constant 0 : index
    %c0_0 = arith.constant 0 : index
    %0 = vector.load %arg0[%c0, %c0_0] : memref<2x400xf32, #tpu.memory_space<vmem>>, vector<2x400xf32>
    %1 = arith.truncf %0 : vector<2x400xf32> to vector<2x400xbf16>
    %c0_1 = arith.constant 0 : index
    %c0_2 = arith.constant 0 : index
    %2 = vector.load %arg1[%c0_1, %c0_2] : memref<400x10xf32, #tpu.memory_space<vmem>>, vector<400x10xf32>
    %3 = arith.truncf %2 : vector<400x10xf32> to vector<400x10xbf16>
    %cst = arith.constant dense<0.000000e+00> : vector<2x10xf32>
    %4 = tpu.matmul %1, %3, %cst {dimension_numbers = #tpu.dot_dimension_numbers<[1], [0], [0], [1], [0, 0, 1, 1], [], []>} : vector<2x400xbf16>, vector<400x10xbf16>, vector<2x10xf32> -> vector<2x10xf32>
    %c0_3 = arith.constant 0 : index
    %c0_4 = arith.constant 0 : index
    %5 = vector.load %arg2[%c0_3, %c0_4] : memref<1x10xf32, #tpu.memory_space<vmem>>, vector<1x10xf32>
    %6 = vector.broadcast %5 : vector<1x10xf32> to vector<2x10xf32>
    %7 = arith.addf %4, %6 : vector<2x10xf32>
    %c0_5 = arith.constant 0 : index
    %c0_6 = arith.constant 0 : index
    %8 = vector.load %arg3[%c0_5, %c0_6] : memref<2x10xf32, #tpu.memory_space<vmem>>, vector<2x10xf32>
    tpu.vector_store %arg3[%c0_5, %c0_6], %7 {strides = array<i32>} : memref<2x10xf32, #tpu.memory_space<vmem>>, vector<2x10xf32>,
    return
  }
}

</mosaic_0001>

<bundles_post_ra>
// kernel: dnn_v1_forward.3
= control target key start
LH: loop header
LB: loop body
LE: loop exit
PB: predicated region body
PF: predicated region fallthrough
CT: control target
= control target key end

     0   :  { %vm184_vm0 = vcmask 1043456   ;;  %vm185_vm1 = vcmask 1044480   ;;  %v1671_v2 = vmov 65535   ;;  %vm108_vm2 = vcmask 203776   ;;  %s2807_s4 = inlined_call_operand.vmem [shape: f32[25,6], index: 4, kind: input, shape index: {}]   ;;  %s2808_s0 = inlined_call_operand.vmem [shape: f32[392,25], index: 0, kind: input, shape index: {}]   ;;  %s2809_s1 = inlined_call_operand.vmem [shape: f32[392,25], index: 1, kind: input, shape index: {}]   ;;  %s2810_s2 = inlined_call_operand.vmem [shape: f32[392,25], index: 2, kind: input, shape index: {}]   ;;  %s2811_s3 = inlined_call_operand.vmem [shape: f32[392,25], index: 3, kind: input, shape index: {}]   ;;  %s2812_s5 = inlined_call_operand.vmem [shape: f32[1,6], index: 5, kind: input, shape index: {}]   ;;  %s2813_s6 = inlined_call_operand.vmem [shape: f32[392,6], index: 6, kind: output, shape index: {}]  }
   0x1   :  { %v26_v0 = vld [vmem:[%s2807_s4 + $0x10] sm:$0xff]  ;;  %v27_v1 = vld [vmem:[%s2807_s4 + $0x18] sm:$0x1]  ;;  %v186_v3 = vsel %vm184_vm0, 4294967295, %v1671_v2  ;;  %v24_v6 = vld [vmem:[%s2807_s4] sm:$0xff]  ;;  %vm1513_vm3 = vcmask 48128  }
   0x2   :  { %v29_v4 = vpack.c.bf16 %v27_v1, %v26_v0  ;;  %v187_v5 = vsel %vm185_vm1, %v186_v3, 0  ;;  %v25_v7 = vld [vmem:[%s2807_s4 + $0x8] sm:$0xff]  ;;  %v31_v9 = vld [vmem:[%s2808_s0] sm:$0xff]  ;;  %v33_v22 = vld [vmem:[%s2808_s0 + $0x10] sm:$0xff] }
   0x3   :  { %v32_v10 = vld [vmem:[%s2808_s0 + $0x8] sm:$0xff]  ;;  %v28_v11 = vpack.c.bf16 %v25_v7, %v24_v6  ;;  %v373_v12 = vld [vmem:[%s2809_s1] sm:$0xff]  ;;  %v34_v23 = vld [vmem:[%s2808_s0 + $0x18] sm:$0xff] }
   0x4   :  { %v189_v8 = vand.u32 %v187_v5, %v29_v4  ;;  %v374_v13 = vld [vmem:[%s2809_s1 + $0x8] sm:$0xff]  ;;  %v753_v14 = vld [vmem:[%s2810_s2] sm:$0xff]  ;;  %v80_v18 = vpack.c.bf16 %v32_v10, %v31_v9  ;;  %v375_v24 = vld [vmem:[%s2809_s1 + $0x10] sm:$0xff]  ;;  %v81_v30 = vpack.c.bf16 %v34_v23, %v33_v22 }
   0x5   :  { %v754_v15 = vld [vmem:[%s2810_s2 + $0x8] sm:$0xff]  ;;  %v1084_v16 = vld [vmem:[%s2811_s3] sm:$0xff]  ;;  %v422_v19 = vpack.c.bf16 %v374_v13, %v373_v12  ;;  %v376_v25 = vld [vmem:[%s2809_s1 + $0x18] sm:$0xff] }
   0x6   :  { %197 = vmatpush.bf16.msra.mxu0 %v189_v8  ;;  %528 = vmatpush.bf16.msra.mxu1 %v189_v8  ;;  %v1085_v17 = vld [vmem:[%s2811_s3 + $0x8] sm:$0xff]  ;;  %v802_v20 = vpack.c.bf16 %v754_v15, %v753_v14  ;;  %v755_v26 = vld [vmem:[%s2810_s2 + $0x10] sm:$0xff]  ;;  %v756_v27 = vld [vmem:[%s2810_s2 + $0x18] sm:$0xff]  ;;  %v423_v31 = vpack.c.bf16 %v376_v25, %v375_v24 }
   0x7   :  { %908 = vmatpush.bf16.msra.mxu2 %v189_v8  ;;  %1239 = vmatpush.bf16.msra.mxu3 %v189_v8  ;;  %v1133_v21 = vpack.c.bf16 %v1085_v17, %v1084_v16  ;;  %v1086_v28 = vld [vmem:[%s2811_s3 + $0x10] sm:$0xff]  ;;  %v1087_v29 = vld [vmem:[%s2811_s3 + $0x18] sm:$0xff]  ;;  %v803_v32 = vpack.c.bf16 %v756_v27, %v755_v26  ;;  %v35_v34 = vld [vmem:[%s2808_s0 + $0x20] sm:$0xff] }
   0x8   :  { %v1134_v33 = vpack.c.bf16 %v1087_v29, %v1086_v28  ;;  %v36_v35 = vld [vmem:[%s2808_s0 + $0x28] sm:$0xff]  ;;  %v377_v36 = vld [vmem:[%s2809_s1 + $0x20] sm:$0xff]  ;;  %v37_v46 = vld [vmem:[%s2808_s0 + $0x30] sm:$0xff] }
   0x9   :  { %v378_v37 = vld [vmem:[%s2809_s1 + $0x28] sm:$0xff]  ;;  %v757_v38 = vld [vmem:[%s2810_s2 + $0x20] sm:$0xff]  ;;  %v82_v42 = vpack.c.bf16 %v36_v35, %v35_v34  ;;  %v38_v47 = vld [vmem:[%s2808_s0 + $0x38] sm:$0xff] }
   0xa   :  { %198 = vmatpush.bf16.msra.mxu0 %v28_v11  ;;  %529 = vmatpush.bf16.msra.mxu1 %v28_v11  ;;  %v758_v39 = vld [vmem:[%s2810_s2 + $0x28] sm:$0xff]  ;;  %v1088_v40 = vld [vmem:[%s2811_s3 + $0x20] sm:$0xff]  ;;  %v424_v43 = vpack.c.bf16 %v378_v37, %v377_v36  ;;  %v379_v48 = vld [vmem:[%s2809_s1 + $0x30] sm:$0xff]  ;;  %v83_v54 = vpack.c.bf16 %v38_v47, %v37_v46 }
   0xb   :  { %909 = vmatpush.bf16.msra.mxu2 %v28_v11  ;;  %1240 = vmatpush.bf16.msra.mxu3 %v28_v11  ;;  %v1089_v41 = vld [vmem:[%s2811_s3 + $0x28] sm:$0xff]  ;;  %v804_v44 = vpack.c.bf16 %v758_v39, %v757_v38  ;;  %v380_v49 = vld [vmem:[%s2809_s1 + $0x38] sm:$0xff]  ;;  %v759_v50 = vld [vmem:[%s2810_s2 + $0x30] sm:$0xff] }
   0xc   :  { %v1135_v45 = vpack.c.bf16 %v1089_v41, %v1088_v40  ;;  %v760_v51 = vld [vmem:[%s2810_s2 + $0x38] sm:$0xff]  ;;  %v1090_v52 = vld [vmem:[%s2811_s3 + $0x30] sm:$0xff]  ;;  %v425_v55 = vpack.c.bf16 %v380_v49, %v379_v48  ;;  %v39_v58 = vld [vmem:[%s2808_s0 + $0x40] sm:$0xff] }
   0xd   :  { %1567 = vmatmul.msk.bf16.vlgmr.msra.gmra.mxu0 %vm108_vm2, %v80_v18  ;;  %1592 = vmatmul.msk.bf16.vlgmr.msra.gmra.mxu1 %vm108_vm2, %v422_v19  ;;  %v1091_v53 = vld [vmem:[%s2811_s3 + $0x38] sm:$0xff]  ;;  %v805_v56 = vpack.c.bf16 %v760_v51, %v759_v50  ;;  %v40_v59 = vld [vmem:[%s2808_s0 + $0x48] sm:$0xff]  ;;  %v381_v60 = vld [vmem:[%s2809_s1 + $0x40] sm:$0xff] }
   0xe   :  { %1617 = vmatmul.msk.bf16.vlgmr.msra.gmra.mxu2 %vm108_vm2, %v802_v20  ;;  %1642 = vmatmul.msk.bf16.vlgmr.msra.gmra.mxu3 %vm108_vm2, %v1133_v21  ;;  %v1136_v57 = vpack.c.bf16 %v1091_v53, %v1090_v52  ;;  %v382_v61 = vld [vmem:[%s2809_s1 + $0x48] sm:$0xff]  ;;  %v761_v62 = vld [vmem:[%s2810_s2 + $0x40] sm:$0xff]  ;;  %v84_v2 = vpack.c.bf16 %v40_v59, %v39_v58  ;;  %v41_v6 = vld [vmem:[%s2808_s0 + $0x50] sm:$0xff] }
   0xf   :  { %v762_v63 = vld [vmem:[%s2810_s2 + $0x48] sm:$0xff]  ;;  %v1092_v0 = vld [vmem:[%s2811_s3 + $0x40] sm:$0xff]  ;;  %v426_v3 = vpack.c.bf16 %v382_v61, %v381_v60  ;;  %v42_v7 = vld [vmem:[%s2808_s0 + $0x58] sm:$0xff] }
  0x10   :  { %v1093_v1 = vld [vmem:[%s2811_s3 + $0x48] sm:$0xff]  ;;  %v806_v4 = vpack.c.bf16 %v762_v63, %v761_v62  ;;  %v383_v8 = vld [vmem:[%s2809_s1 + $0x50] sm:$0xff]  ;;  %v384_v9 = vld [vmem:[%s2809_s1 + $0x58] sm:$0xff]  ;;  %v85_v14 = vpack.c.bf16 %v42_v7, %v41_v6 }
  0x11   :  { %v1137_v5 = vpack.c.bf16 %v1093_v1, %v1092_v0  ;;  %v763_v10 = vld [vmem:[%s2810_s2 + $0x50] sm:$0xff]  ;;  %v764_v11 = vld [vmem:[%s2810_s2 + $0x58] sm:$0xff]  ;;  %v427_v15 = vpack.c.bf16 %v384_v9, %v383_v8  ;;  %v43_v18 = vld [vmem:[%s2808_s0 + $0x60] sm:$0xff] }
  0x12   :  { %v1094_v12 = vld [vmem:[%s2811_s3 + $0x50] sm:$0xff]  ;;  %v1095_v13 = vld [vmem:[%s2811_s3 + $0x58] sm:$0xff]  ;;  %v807_v16 = vpack.c.bf16 %v764_v11, %v763_v10  ;;  %v44_v19 = vld [vmem:[%s2808_s0 + $0x68] sm:$0xff] }
  0x13   :  { %v1138_v17 = vpack.c.bf16 %v1095_v13, %v1094_v12  ;;  %v385_v20 = vld [vmem:[%s2809_s1 + $0x60] sm:$0xff]  ;;  %v386_v21 = vld [vmem:[%s2809_s1 + $0x68] sm:$0xff]  ;;  %v86_v26 = vpack.c.bf16 %v44_v19, %v43_v18  ;;  %v767_v34 = vld [vmem:[%s2810_s2 + $0x70] sm:$0xff] }
  0x14   :  { %v765_v22 = vld [vmem:[%s2810_s2 + $0x60] sm:$0xff]  ;;  %v766_v23 = vld [vmem:[%s2810_s2 + $0x68] sm:$0xff]  ;;  %v428_v27 = vpack.c.bf16 %v386_v21, %v385_v20  ;;  %v768_v35 = vld [vmem:[%s2810_s2 + $0x78] sm:$0xff] }
  0x15   :  { %v1096_v24 = vld [vmem:[%s2811_s3 + $0x60] sm:$0xff]  ;;  %v1097_v25 = vld [vmem:[%s2811_s3 + $0x68] sm:$0xff]  ;;  %v808_v28 = vpack.c.bf16 %v766_v23, %v765_v22  ;;  %v1098_v36 = vld [vmem:[%s2811_s3 + $0x70] sm:$0xff]  ;;  %v809_v40 = vpack.c.bf16 %v768_v35, %v767_v34 }
  0x16   :  { %v1139_v29 = vpack.c.bf16 %v1097_v25, %v1096_v24  ;;  %v1099_v37 = vld [vmem:[%s2811_s3 + $0x78] sm:$0xff]  ;;  %v769_v46 = vld [vmem:[%s2810_s2 + $0x80] sm:$0xff]  ;;  %v770_v47 = vld [vmem:[%s2810_s2 + $0x88] sm:$0xff] }
  0x17   :  { %v1140_v41 = vpack.c.bf16 %v1099_v37, %v1098_v36  ;;  %v1100_v48 = vld [vmem:[%s2811_s3 + $0x80] sm:$0xff]  ;;  %v1101_v49 = vld [vmem:[%s2811_s3 + $0x88] sm:$0xff]  ;;  %v49_v6 = vld [vmem:[%s2808_s0 + $0x90] sm:$0xff] }
  0x18   :  { %v1970_v50 = vld [vmem:[%s2812_s5] ss:$0 sm:$0xff]  ;;  %v50_v7 = vld [vmem:[%s2808_s0 + $0x98] sm:$0xff]  ;;  %v391_v8 = vld [vmem:[%s2809_s1 + $0x90] sm:$0xff] }
  0x19   :  { %v392_v9 = vld [vmem:[%s2809_s1 + $0x98] sm:$0xff]  ;;  %v771_v10 = vld [vmem:[%s2810_s2 + $0x90] sm:$0xff]  ;;  %v89_v20 = vpack.c.bf16 %v50_v7, %v49_v6 }
  0x1a   :  { %v431_v21 = vpack.c.bf16 %v392_v9, %v391_v8 }
  0x1d   :  { %1568 = vmatmul.msk.bf16.gmra.mxu0 %vm108_vm2, %v81_v30  ;;  %1593 = vmatmul.msk.bf16.gmra.mxu1 %vm108_vm2, %v423_v31  ;;  %v45_v30 = vld [vmem:[%s2808_s0 + $0x70] sm:$0xff]  ;;  %v46_v31 = vld [vmem:[%s2808_s0 + $0x78] sm:$0xff] }
  0x1e   :  { %1618 = vmatmul.msk.bf16.gmra.mxu2 %vm108_vm2, %v803_v32  ;;  %1643 = vmatmul.msk.bf16.gmra.mxu3 %vm108_vm2, %v1134_v33  ;;  %v387_v32 = vld [vmem:[%s2809_s1 + $0x70] sm:$0xff]  ;;  %v388_v33 = vld [vmem:[%s2809_s1 + $0x78] sm:$0xff]  ;;  %v87_v38 = vpack.c.bf16 %v46_v31, %v45_v30 }
  0x1f   :  { %v429_v39 = vpack.c.bf16 %v388_v33, %v387_v32 }
  0x2d   :  { %1569 = vmatmul.msk.bf16.gmra.mxu0 %vm108_vm2, %v82_v42  ;;  %1594 = vmatmul.msk.bf16.gmra.mxu1 %vm108_vm2, %v424_v43  ;;  %v47_v42 = vld [vmem:[%s2808_s0 + $0x80] sm:$0xff]  ;;  %v48_v43 = vld [vmem:[%s2808_s0 + $0x88] sm:$0xff] }
  0x2e   :  { %1619 = vmatmul.msk.bf16.gmra.mxu2 %vm108_vm2, %v804_v44  ;;  %1644 = vmatmul.msk.bf16.gmra.mxu3 %vm108_vm2, %v1135_v45  ;;  %v389_v44 = vld [vmem:[%s2809_s1 + $0x80] sm:$0xff]  ;;  %v390_v45 = vld [vmem:[%s2809_s1 + $0x88] sm:$0xff]  ;;  %v88_v51 = vpack.c.bf16 %v48_v43, %v47_v42 }
  0x2f   :  { %v430_v52 = vpack.c.bf16 %v390_v45, %v389_v44 }
  0x3d   :  { %1570 = vmatmul.msk.bf16.gmra.mxu0 %vm108_vm2, %v83_v54  ;;  %1595 = vmatmul.msk.bf16.gmra.mxu1 %vm108_vm2, %v425_v55  ;;  %v810_v55 = vpack.c.bf16 %v770_v47, %v769_v46 }
  0x3e   :  { %1620 = vmatmul.msk.bf16.gmra.mxu2 %vm108_vm2, %v805_v56  ;;  %1645 = vmatmul.msk.bf16.gmra.mxu3 %vm108_vm2, %v1136_v57  ;;  %v1141_v56 = vpack.c.bf16 %v1101_v49, %v1100_v48  ;;  %v51_v48 = vld [vmem:[%s2808_s0 + $0xa0] sm:$0xff]  ;;  %v52_v49 = vld [vmem:[%s2808_s0 + $0xa8] sm:$0xff] }
  0x4d   :  { %1571 = vmatmul.msk.bf16.gmra.mxu0 %vm108_vm2, %v84_v2  ;;  %1596 = vmatmul.msk.bf16.gmra.mxu1 %vm108_vm2, %v426_v3 }
  0x4e   :  { %1621 = vmatmul.msk.bf16.gmra.mxu2 %vm108_vm2, %v806_v4  ;;  %1646 = vmatmul.msk.bf16.gmra.mxu3 %vm108_vm2, %v1137_v5 }
  0x5d   :  { %1572 = vmatmul.msk.bf16.gmra.mxu0 %vm108_vm2, %v85_v14  ;;  %1597 = vmatmul.msk.bf16.gmra.mxu1 %vm108_vm2, %v427_v15  ;;  %v772_v14 = vld [vmem:[%s2810_s2 + $0x98] sm:$0xff]  ;;  %v1102_v15 = vld [vmem:[%s2811_s3 + $0x90] sm:$0xff] }
  0x5e   :  { %1622 = vmatmul.msk.bf16.gmra.mxu2 %vm108_vm2, %v807_v16  ;;  %1647 = vmatmul.msk.bf16.gmra.mxu3 %vm108_vm2, %v1138_v17  ;;  %v1103_v16 = vld [vmem:[%s2811_s3 + $0x98] sm:$0xff]  ;;  %v811_v22 = vpack.c.bf16 %v772_v14, %v771_v10 }
  0x5f   :  { %v1142_v23 = vpack.c.bf16 %v1103_v16, %v1102_v15 }
  0x6d   :  { %1573 = vmatmul.msk.bf16.gmra.mxu0 %vm108_vm2, %v86_v26  ;;  %1598 = vmatmul.msk.bf16.gmra.mxu1 %vm108_vm2, %v428_v27 }
  0x6e   :  { %1623 = vmatmul.msk.bf16.gmra.mxu2 %vm108_vm2, %v808_v28  ;;  %1648 = vmatmul.msk.bf16.gmra.mxu3 %vm108_vm2, %v1139_v29 }
  0x7d   :  { %1574 = vmatmul.msk.bf16.gmra.mxu0 %vm108_vm2, %v87_v38  ;;  %1599 = vmatmul.msk.bf16.gmra.mxu1 %vm108_vm2, %v429_v39 }
  0x7e   :  { %1624 = vmatmul.msk.bf16.gmra.mxu2 %vm108_vm2, %v809_v40  ;;  %1649 = vmatmul.msk.bf16.gmra.mxu3 %vm108_vm2, %v1140_v41 }
  0x8a   :  { %v200_v53 = vpop.f32.mrf.mxu0  ;;  %v531_v54 = vpop.f32.mrf.mxu1 }
  0x8b   :  { %v201_v57 = vadd.f32 %v1970_v50, %v200_v53  ;;  %v532_v58 = vadd.f32 %v1970_v50, %v531_v54  ;;  %v773_v53 = vld [vmem:[%s2810_s2 + $0xa0] sm:$0xff] }
  0x8d   :  { %1575 = vmatmul.msk.bf16.gmra.mxu0 %vm108_vm2, %v88_v51  ;;  %1600 = vmatmul.msk.bf16.gmra.mxu1 %vm108_vm2, %v430_v52  ;;  %v324_v59 = vmax.f32 %v201_v57, 0.0  ;;  %v655_v60 = vmax.f32 %v532_v58, 0.0  ;;  %v393_v51 = vld [vmem:[%s2809_s1 + $0xa0] sm:$0xff]  ;;  %v394_v52 = vld [vmem:[%s2809_s1 + $0xa8] sm:$0xff] }
  0x8e   :  { %1625 = vmatmul.msk.bf16.gmra.mxu2 %vm108_vm2, %v810_v55  ;;  %1650 = vmatmul.msk.bf16.gmra.mxu3 %vm108_vm2, %v1141_v56  ;;  %v774_v57 = vld [vmem:[%s2810_s2 + $0xa8] sm:$0xff]  ;;  %v1104_v58 = vld [vmem:[%s2811_s3 + $0xa0] sm:$0xff] }
  0x8f   :  { %v704_v3 = vmax.f32 %v324_v59, %v655_v60  ;;  %v1105_v59 = vld [vmem:[%s2811_s3 + $0xa8] sm:$0xff] }
  0x91   :  { %v911_v61 = vpop.f32.mrf.mxu2  ;;  %v1242_v62 = vpop.f32.mrf.mxu3 }
  0x92   :  { %v912_v63 = vadd.f32 %v1970_v50, %v911_v61  ;;  %v1243_v0 = vadd.f32 %v1970_v50, %v1242_v62  ;;  %v202_v1 = vpop.f32.mrf.mxu0  ;;  %v533_v2 = vpop.f32.mrf.mxu1 }
  0x93   :  { %v203_v12 = vadd.f32 %v1970_v50, %v202_v1  ;;  %v534_v13 = vadd.f32 %v1970_v50, %v533_v2  ;;  %v812_v1 = vpack.c.bf16 %v774_v57, %v773_v53  ;;  %v1143_v2 = vpack.c.bf16 %v1105_v59, %v1104_v58 }
  0x94   :  { %v1035_v4 = vmax.f32 %v912_v63, 0.0  ;;  %v1366_v5 = vmax.f32 %v1243_v0, 0.0  ;;  %v90_v63 = vpack.c.bf16 %v52_v49, %v51_v48  ;;  %v432_v0 = vpack.c.bf16 %v394_v52, %v393_v51 }
  0x95   :  { %v325_v24 = vmax.f32 %v203_v12, 0.0  ;;  %v656_v25 = vmax.f32 %v534_v13, 0.0 }
  0x96   :  { %v1415_v11 = vmax.f32 %v1035_v4, %v1366_v5 }
  0x97   :  { %v705_v34 = vmax.f32 %v325_v24, %v656_v25 }
  0x98   :  { %v1464_v17 = vmax.f32 %v704_v3, %v1415_v11 }
  0x99   :  { %v913_v18 = vpop.f32.mrf.mxu2  ;;  %v1244_v19 = vpop.f32.mrf.mxu3 }
  0x9a   :  { %1514 = vst.msk [vmem:[%s2813_s6] sm:$0xff] %vm1513_vm3, %v1464_v17  ;;  %v914_v26 = vadd.f32 %v1970_v50, %v913_v18  ;;  %v1245_v27 = vadd.f32 %v1970_v50, %v1244_v19  ;;  %v205_v28 = vpop.f32.mrf.mxu0  ;;  %v536_v29 = vpop.f32.mrf.mxu1 }
  0x9b   :  { %v206_v32 = vadd.f32 %v1970_v50, %v205_v28  ;;  %v537_v33 = vadd.f32 %v1970_v50, %v536_v29  ;;  %v54_v28 = vld [vmem:[%s2808_s0 + $0xb8] sm:$0xff]  ;;  %v395_v29 = vld [vmem:[%s2809_s1 + $0xb0] sm:$0xff] }
  0x9c   :  { %v1036_v30 = vmax.f32 %v914_v26, 0.0  ;;  %v1367_v31 = vmax.f32 %v1245_v27, 0.0  ;;  %v53_v27 = vld [vmem:[%s2808_s0 + $0xb0] sm:$0xff] }
  0x9d   :  { %1576 = vmatmul.msk.bf16.gmra.mxu0 %vm108_vm2, %v89_v20  ;;  %1601 = vmatmul.msk.bf16.gmra.mxu1 %vm108_vm2, %v431_v21  ;;  %v326_v37 = vmax.f32 %v206_v32, 0.0  ;;  %v657_v38 = vmax.f32 %v537_v33, 0.0 }
  0x9e   :  { %v1416_v35 = vmax.f32 %v1036_v30, %v1367_v31  ;;  %1626 = vmatmul.msk.bf16.gmra.mxu2 %vm108_vm2, %v811_v22  ;;  %1651 = vmatmul.msk.bf16.gmra.mxu3 %vm108_vm2, %v1142_v23  ;;  %v396_v30 = vld [vmem:[%s2809_s1 + $0xb8] sm:$0xff]  ;;  %v775_v31 = vld [vmem:[%s2810_s2 + $0xb0] sm:$0xff] }
  0x9f   :  { %v706_v45 = vmax.f32 %v326_v37, %v657_v38  ;;  %v1107_v37 = vld [vmem:[%s2811_s3 + $0xb8] sm:$0xff] }
  0xa0   :  { %v1465_v36 = vmax.f32 %v705_v34, %v1416_v35  ;;  %v776_v35 = vld [vmem:[%s2810_s2 + $0xb8] sm:$0xff] }
  0xa1   :  { %v916_v39 = vpop.f32.mrf.mxu2  ;;  %v1247_v40 = vpop.f32.mrf.mxu3 }
  0xa2   :  { %1515 = vst.msk [vmem:[%s2813_s6 + $0x8] sm:$0xff] %vm1513_vm3, %v1465_v36  ;;  %v917_v41 = vadd.f32 %v1970_v50, %v916_v39  ;;  %v1248_v42 = vadd.f32 %v1970_v50, %v1247_v40  ;;  %v207_v43 = vpop.f32.mrf.mxu0  ;;  %v538_v44 = vpop.f32.mrf.mxu1  ;;  %v1106_v36 = vld [vmem:[%s2811_s3 + $0xb0] sm:$0xff] }
  0xa3   :  { %v208_v55 = vadd.f32 %v1970_v50, %v207_v43  ;;  %v539_v56 = vadd.f32 %v1970_v50, %v538_v44  ;;  %v813_v43 = vpack.c.bf16 %v776_v35, %v775_v31  ;;  %v1144_v44 = vpack.c.bf16 %v1107_v37, %v1106_v36 }
  0xa4   :  { %v1037_v46 = vmax.f32 %v917_v41, 0.0  ;;  %v1368_v47 = vmax.f32 %v1248_v42, 0.0  ;;  %v91_v41 = vpack.c.bf16 %v54_v28, %v53_v27  ;;  %v433_v42 = vpack.c.bf16 %v396_v30, %v395_v29 }
  0xa5   :  { %v327_v3 = vmax.f32 %v208_v55, 0.0  ;;  %v658_v4 = vmax.f32 %v539_v56, 0.0 }
  0xa6   :  { %v1417_v54 = vmax.f32 %v1037_v46, %v1368_v47 }
  0xa7   :  { %v707_v13 = vmax.f32 %v327_v3, %v658_v4 }
  0xa8   :  { %v1466_v60 = vmax.f32 %v706_v45, %v1417_v54 }
  0xa9   :  { %v918_v61 = vpop.f32.mrf.mxu2  ;;  %v1249_v62 = vpop.f32.mrf.mxu3 }
  0xaa   :  { %1516 = vst.msk [vmem:[%s2813_s6 + $0x10] sm:$0xff] %vm1513_vm3, %v1466_v60  ;;  %v919_v5 = vadd.f32 %v1970_v50, %v918_v61  ;;  %v1250_v6 = vadd.f32 %v1970_v50, %v1249_v62  ;;  %v210_v7 = vpop.f32.mrf.mxu0  ;;  %v541_v8 = vpop.f32.mrf.mxu1 }
  0xab   :  { %v211_v11 = vadd.f32 %v1970_v50, %v210_v7  ;;  %v542_v12 = vadd.f32 %v1970_v50, %v541_v8  ;;  %v56_v7 = vld [vmem:[%s2808_s0 + $0xc8] sm:$0xff]  ;;  %v397_v8 = vld [vmem:[%s2809_s1 + $0xc0] sm:$0xff] }
  0xac   :  { %v1038_v9 = vmax.f32 %v919_v5, 0.0  ;;  %v1369_v10 = vmax.f32 %v1250_v6, 0.0  ;;  %v55_v6 = vld [vmem:[%s2808_s0 + $0xc0] sm:$0xff] }
  0xad   :  { %1577 = vmatmul.msk.bf16.gmra.mxu0 %vm108_vm2, %v90_v63  ;;  %1602 = vmatmul.msk.bf16.gmra.mxu1 %vm108_vm2, %v432_v0  ;;  %v328_v16 = vmax.f32 %v211_v11, 0.0  ;;  %v659_v17 = vmax.f32 %v542_v12, 0.0 }
  0xae   :  { %v1418_v14 = vmax.f32 %v1038_v9, %v1369_v10  ;;  %1627 = vmatmul.msk.bf16.gmra.mxu2 %vm108_vm2, %v812_v1  ;;  %1652 = vmatmul.msk.bf16.gmra.mxu3 %vm108_vm2, %v1143_v2  ;;  %v398_v9 = vld [vmem:[%s2809_s1 + $0xc8] sm:$0xff]  ;;  %v777_v10 = vld [vmem:[%s2810_s2 + $0xc0] sm:$0xff] }
  0xaf   :  { %v708_v24 = vmax.f32 %v328_v16, %v659_v17  ;;  %v1109_v16 = vld [vmem:[%s2811_s3 + $0xc8] sm:$0xff] }
  0xb0   :  { %v1467_v15 = vmax.f32 %v707_v13, %v1418_v14  ;;  %v778_v14 = vld [vmem:[%s2810_s2 + $0xc8] sm:$0xff] }
  0xb1   :  { %v921_v18 = vpop.f32.mrf.mxu2  ;;  %v1252_v19 = vpop.f32.mrf.mxu3 }
  0xb2   :  { %1517 = vst.msk [vmem:[%s2813_s6 + $0x18] sm:$0xff] %vm1513_vm3, %v1467_v15  ;;  %v922_v20 = vadd.f32 %v1970_v50, %v921_v18  ;;  %v1253_v21 = vadd.f32 %v1970_v50, %v1252_v19  ;;  %v212_v22 = vpop.f32.mrf.mxu0  ;;  %v543_v23 = vpop.f32.mrf.mxu1  ;;  %v1108_v15 = vld [vmem:[%s2811_s3 + $0xc0] sm:$0xff] }
  0xb3   :  { %v213_v33 = vadd.f32 %v1970_v50, %v212_v22  ;;  %v544_v34 = vadd.f32 %v1970_v50, %v543_v23  ;;  %v814_v22 = vpack.c.bf16 %v778_v14, %v777_v10  ;;  %v1145_v23 = vpack.c.bf16 %v1109_v16, %v1108_v15 }
  0xb4   :  { %v1039_v25 = vmax.f32 %v922_v20, 0.0  ;;  %v1370_v26 = vmax.f32 %v1253_v21, 0.0  ;;  %v92_v20 = vpack.c.bf16 %v56_v7, %v55_v6  ;;  %v434_v21 = vpack.c.bf16 %v398_v9, %v397_v8 }
  0xb5   :  { %v329_v45 = vmax.f32 %v213_v33, 0.0  ;;  %v660_v46 = vmax.f32 %v544_v34, 0.0 }
  0xb6   :  { %v1419_v32 = vmax.f32 %v1039_v25, %v1370_v26 }
  0xb7   :  { %v709_v56 = vmax.f32 %v329_v45, %v660_v46 }
  0xb8   :  { %v1468_v38 = vmax.f32 %v708_v24, %v1419_v32 }
  0xb9   :  { %v923_v39 = vpop.f32.mrf.mxu2  ;;  %v1254_v40 = vpop.f32.mrf.mxu3 }
  0xba   :  { %1518 = vst.msk [vmem:[%s2813_s6 + $0x20] sm:$0xff] %vm1513_vm3, %v1468_v38  ;;  %v924_v47 = vadd.f32 %v1970_v50, %v923_v39  ;;  %v1255_v48 = vadd.f32 %v1970_v50, %v1254_v40  ;;  %v215_v49 = vpop.f32.mrf.mxu0  ;;  %v546_v51 = vpop.f32.mrf.mxu1 }
  0xbb   :  { %v216_v54 = vadd.f32 %v1970_v50, %v215_v49  ;;  %v547_v55 = vadd.f32 %v1970_v50, %v546_v51  ;;  %v58_v49 = vld [vmem:[%s2808_s0 + $0xd8] sm:$0xff]  ;;  %v399_v51 = vld [vmem:[%s2809_s1 + $0xd0] sm:$0xff] }
  0xbc   :  { %v1040_v52 = vmax.f32 %v924_v47, 0.0  ;;  %v1371_v53 = vmax.f32 %v1255_v48, 0.0  ;;  %v57_v48 = vld [vmem:[%s2808_s0 + $0xd0] sm:$0xff] }
  0xbd   :  { %1578 = vmatmul.msk.bf16.gmra.mxu0 %vm108_vm2, %v91_v41  ;;  %1603 = vmatmul.msk.bf16.gmra.mxu1 %vm108_vm2, %v433_v42  ;;  %v330_v59 = vmax.f32 %v216_v54, 0.0  ;;  %v661_v60 = vmax.f32 %v547_v55, 0.0 }
  0xbe   :  { %v1420_v57 = vmax.f32 %v1040_v52, %v1371_v53  ;;  %1628 = vmatmul.msk.bf16.gmra.mxu2 %vm108_vm2, %v813_v43  ;;  %1653 = vmatmul.msk.bf16.gmra.mxu3 %vm108_vm2, %v1144_v44  ;;  %v400_v52 = vld [vmem:[%s2809_s1 + $0xd8] sm:$0xff]  ;;  %v779_v53 = vld [vmem:[%s2810_s2 + $0xd0] sm:$0xff] }
  0xbf   :  { %v710_v3 = vmax.f32 %v330_v59, %v661_v60  ;;  %v1111_v59 = vld [vmem:[%s2811_s3 + $0xd8] sm:$0xff] }
  0xc0   :  { %v1469_v58 = vmax.f32 %v709_v56, %v1420_v57  ;;  %v780_v57 = vld [vmem:[%s2810_s2 + $0xd8] sm:$0xff] }
  0xc1   :  { %v926_v61 = vpop.f32.mrf.mxu2  ;;  %v1257_v62 = vpop.f32.mrf.mxu3 }
  0xc2   :  { %1519 = vst.msk [vmem:[%s2813_s6 + $0x28] sm:$0xff] %vm1513_vm3, %v1469_v58  ;;  %v927_v63 = vadd.f32 %v1970_v50, %v926_v61  ;;  %v1258_v0 = vadd.f32 %v1970_v50, %v1257_v62  ;;  %v217_v1 = vpop.f32.mrf.mxu0  ;;  %v548_v2 = vpop.f32.mrf.mxu1  ;;  %v1110_v58 = vld [vmem:[%s2811_s3 + $0xd0] sm:$0xff] }
  0xc3   :  { %v218_v12 = vadd.f32 %v1970_v50, %v217_v1  ;;  %v549_v13 = vadd.f32 %v1970_v50, %v548_v2  ;;  %v815_v1 = vpack.c.bf16 %v780_v57, %v779_v53  ;;  %v1146_v2 = vpack.c.bf16 %v1111_v59, %v1110_v58 }
  0xc4   :  { %v1041_v4 = vmax.f32 %v927_v63, 0.0  ;;  %v1372_v5 = vmax.f32 %v1258_v0, 0.0  ;;  %v93_v63 = vpack.c.bf16 %v58_v49, %v57_v48  ;;  %v435_v0 = vpack.c.bf16 %v400_v52, %v399_v51 }
  0xc5   :  { %v331_v24 = vmax.f32 %v218_v12, 0.0  ;;  %v662_v25 = vmax.f32 %v549_v13, 0.0 }
  0xc6   :  { %v1421_v11 = vmax.f32 %v1041_v4, %v1372_v5 }
  0xc7   :  { %v711_v34 = vmax.f32 %v331_v24, %v662_v25 }
  0xc8   :  { %v1470_v17 = vmax.f32 %v710_v3, %v1421_v11 }
  0xc9   :  { %v928_v18 = vpop.f32.mrf.mxu2  ;;  %v1259_v19 = vpop.f32.mrf.mxu3 }
  0xca   :  { %1520 = vst.msk [vmem:[%s2813_s6 + $0x30] sm:$0xff] %vm1513_vm3, %v1470_v17  ;;  %v929_v26 = vadd.f32 %v1970_v50, %v928_v18  ;;  %v1260_v27 = vadd.f32 %v1970_v50, %v1259_v19  ;;  %v220_v28 = vpop.f32.mrf.mxu0  ;;  %v551_v29 = vpop.f32.mrf.mxu1 }
  0xcb   :  { %v221_v32 = vadd.f32 %v1970_v50, %v220_v28  ;;  %v552_v33 = vadd.f32 %v1970_v50, %v551_v29  ;;  %v60_v28 = vld [vmem:[%s2808_s0 + $0xe8] sm:$0xff]  ;;  %v401_v29 = vld [vmem:[%s2809_s1 + $0xe0] sm:$0xff] }
  0xcc   :  { %v1042_v30 = vmax.f32 %v929_v26, 0.0  ;;  %v1373_v31 = vmax.f32 %v1260_v27, 0.0  ;;  %v59_v27 = vld [vmem:[%s2808_s0 + $0xe0] sm:$0xff] }
  0xcd   :  { %1579 = vmatmul.msk.bf16.gmra.mxu0 %vm108_vm2, %v92_v20  ;;  %1604 = vmatmul.msk.bf16.gmra.mxu1 %vm108_vm2, %v434_v21  ;;  %v332_v37 = vmax.f32 %v221_v32, 0.0  ;;  %v663_v38 = vmax.f32 %v552_v33, 0.0 }
  0xce   :  { %v1422_v35 = vmax.f32 %v1042_v30, %v1373_v31  ;;  %1629 = vmatmul.msk.bf16.gmra.mxu2 %vm108_vm2, %v814_v22  ;;  %1654 = vmatmul.msk.bf16.gmra.mxu3 %vm108_vm2, %v1145_v23  ;;  %v402_v30 = vld [vmem:[%s2809_s1 + $0xe8] sm:$0xff]  ;;  %v781_v31 = vld [vmem:[%s2810_s2 + $0xe0] sm:$0xff] }
  0xcf   :  { %v712_v45 = vmax.f32 %v332_v37, %v663_v38  ;;  %v1113_v37 = vld [vmem:[%s2811_s3 + $0xe8] sm:$0xff] }
  0xd0   :  { %v1471_v36 = vmax.f32 %v711_v34, %v1422_v35  ;;  %v782_v35 = vld [vmem:[%s2810_s2 + $0xe8] sm:$0xff] }
  0xd1   :  { %v931_v39 = vpop.f32.mrf.mxu2  ;;  %v1262_v40 = vpop.f32.mrf.mxu3 }
  0xd2   :  { %1521 = vst.msk [vmem:[%s2813_s6 + $0x38] sm:$0xff] %vm1513_vm3, %v1471_v36  ;;  %v932_v41 = vadd.f32 %v1970_v50, %v931_v39  ;;  %v1263_v42 = vadd.f32 %v1970_v50, %v1262_v40  ;;  %v222_v43 = vpop.f32.mrf.mxu0  ;;  %v553_v44 = vpop.f32.mrf.mxu1  ;;  %v1112_v36 = vld [vmem:[%s2811_s3 + $0xe0] sm:$0xff] }
  0xd3   :  { %v223_v55 = vadd.f32 %v1970_v50, %v222_v43  ;;  %v554_v56 = vadd.f32 %v1970_v50, %v553_v44  ;;  %v816_v43 = vpack.c.bf16 %v782_v35, %v781_v31  ;;  %v1147_v44 = vpack.c.bf16 %v1113_v37, %v1112_v36 }
  0xd4   :  { %v1043_v46 = vmax.f32 %v932_v41, 0.0  ;;  %v1374_v47 = vmax.f32 %v1263_v42, 0.0  ;;  %v94_v41 = vpack.c.bf16 %v60_v28, %v59_v27  ;;  %v436_v42 = vpack.c.bf16 %v402_v30, %v401_v29 }
  0xd5   :  { %v333_v3 = vmax.f32 %v223_v55, 0.0  ;;  %v664_v4 = vmax.f32 %v554_v56, 0.0 }
  0xd6   :  { %v1423_v54 = vmax.f32 %v1043_v46, %v1374_v47 }
  0xd7   :  { %v713_v13 = vmax.f32 %v333_v3, %v664_v4 }
  0xd8   :  { %v1472_v60 = vmax.f32 %v712_v45, %v1423_v54 }
  0xd9   :  { %v933_v61 = vpop.f32.mrf.mxu2  ;;  %v1264_v62 = vpop.f32.mrf.mxu3 }
  0xda   :  { %1522 = vst.msk [vmem:[%s2813_s6 + $0x40] sm:$0xff] %vm1513_vm3, %v1472_v60  ;;  %v934_v5 = vadd.f32 %v1970_v50, %v933_v61  ;;  %v1265_v6 = vadd.f32 %v1970_v50, %v1264_v62  ;;  %v225_v7 = vpop.f32.mrf.mxu0  ;;  %v556_v8 = vpop.f32.mrf.mxu1 }
  0xdb   :  { %v226_v11 = vadd.f32 %v1970_v50, %v225_v7  ;;  %v557_v12 = vadd.f32 %v1970_v50, %v556_v8  ;;  %v62_v7 = vld [vmem:[%s2808_s0 + $0xf8] sm:$0xff]  ;;  %v403_v8 = vld [vmem:[%s2809_s1 + $0xf0] sm:$0xff] }
  0xdc   :  { %v1044_v9 = vmax.f32 %v934_v5, 0.0  ;;  %v1375_v10 = vmax.f32 %v1265_v6, 0.0  ;;  %v61_v6 = vld [vmem:[%s2808_s0 + $0xf0] sm:$0xff] }
  0xdd   :  { %1580 = vmatmul.msk.bf16.gmra.mxu0 %vm108_vm2, %v93_v63  ;;  %1605 = vmatmul.msk.bf16.gmra.mxu1 %vm108_vm2, %v435_v0  ;;  %v334_v16 = vmax.f32 %v226_v11, 0.0  ;;  %v665_v17 = vmax.f32 %v557_v12, 0.0 }
  0xde   :  { %v1424_v14 = vmax.f32 %v1044_v9, %v1375_v10  ;;  %1630 = vmatmul.msk.bf16.gmra.mxu2 %vm108_vm2, %v815_v1  ;;  %1655 = vmatmul.msk.bf16.gmra.mxu3 %vm108_vm2, %v1146_v2  ;;  %v404_v9 = vld [vmem:[%s2809_s1 + $0xf8] sm:$0xff]  ;;  %v783_v10 = vld [vmem:[%s2810_s2 + $0xf0] sm:$0xff] }
  0xdf   :  { %v714_v24 = vmax.f32 %v334_v16, %v665_v17  ;;  %v1115_v16 = vld [vmem:[%s2811_s3 + $0xf8] sm:$0xff] }
  0xe0   :  { %v1473_v15 = vmax.f32 %v713_v13, %v1424_v14  ;;  %v784_v14 = vld [vmem:[%s2810_s2 + $0xf8] sm:$0xff] }
  0xe1   :  { %v936_v18 = vpop.f32.mrf.mxu2  ;;  %v1267_v19 = vpop.f32.mrf.mxu3 }
  0xe2   :  { %1523 = vst.msk [vmem:[%s2813_s6 + $0x48] sm:$0xff] %vm1513_vm3, %v1473_v15  ;;  %v937_v20 = vadd.f32 %v1970_v50, %v936_v18  ;;  %v1268_v21 = vadd.f32 %v1970_v50, %v1267_v19  ;;  %v227_v22 = vpop.f32.mrf.mxu0  ;;  %v558_v23 = vpop.f32.mrf.mxu1  ;;  %v1114_v15 = vld [vmem:[%s2811_s3 + $0xf0] sm:$0xff] }
  0xe3   :  { %v228_v33 = vadd.f32 %v1970_v50, %v227_v22  ;;  %v559_v34 = vadd.f32 %v1970_v50, %v558_v23  ;;  %v817_v22 = vpack.c.bf16 %v784_v14, %v783_v10  ;;  %v1148_v23 = vpack.c.bf16 %v1115_v16, %v1114_v15 }
  0xe4   :  { %v1045_v25 = vmax.f32 %v937_v20, 0.0  ;;  %v1376_v26 = vmax.f32 %v1268_v21, 0.0  ;;  %v95_v20 = vpack.c.bf16 %v62_v7, %v61_v6  ;;  %v437_v21 = vpack.c.bf16 %v404_v9, %v403_v8 }
  0xe5   :  { %v335_v45 = vmax.f32 %v228_v33, 0.0  ;;  %v666_v46 = vmax.f32 %v559_v34, 0.0 }
  0xe6   :  { %v1425_v32 = vmax.f32 %v1045_v25, %v1376_v26 }
  0xe7   :  { %v715_v56 = vmax.f32 %v335_v45, %v666_v46 }
  0xe8   :  { %v1474_v38 = vmax.f32 %v714_v24, %v1425_v32 }
  0xe9   :  { %v938_v39 = vpop.f32.mrf.mxu2  ;;  %v1269_v40 = vpop.f32.mrf.mxu3 }
  0xea   :  { %1524 = vst.msk [vmem:[%s2813_s6 + $0x50] sm:$0xff] %vm1513_vm3, %v1474_v38  ;;  %v939_v47 = vadd.f32 %v1970_v50, %v938_v39  ;;  %v1270_v48 = vadd.f32 %v1970_v50, %v1269_v40  ;;  %v230_v49 = vpop.f32.mrf.mxu0  ;;  %v561_v51 = vpop.f32.mrf.mxu1 }
  0xeb   :  { %v231_v54 = vadd.f32 %v1970_v50, %v230_v49  ;;  %v562_v55 = vadd.f32 %v1970_v50, %v561_v51  ;;  %v64_v49 = vld [vmem:[%s2808_s0 + $0x108] sm:$0xff]  ;;  %v405_v51 = vld [vmem:[%s2809_s1 + $0x100] sm:$0xff] }
  0xec   :  { %v1046_v52 = vmax.f32 %v939_v47, 0.0  ;;  %v1377_v53 = vmax.f32 %v1270_v48, 0.0  ;;  %v63_v48 = vld [vmem:[%s2808_s0 + $0x100] sm:$0xff] }
  0xed   :  { %1581 = vmatmul.msk.bf16.gmra.mxu0 %vm108_vm2, %v94_v41  ;;  %1606 = vmatmul.msk.bf16.gmra.mxu1 %vm108_vm2, %v436_v42  ;;  %v336_v59 = vmax.f32 %v231_v54, 0.0  ;;  %v667_v60 = vmax.f32 %v562_v55, 0.0 }
  0xee   :  { %v1426_v57 = vmax.f32 %v1046_v52, %v1377_v53  ;;  %1631 = vmatmul.msk.bf16.gmra.mxu2 %vm108_vm2, %v816_v43  ;;  %1656 = vmatmul.msk.bf16.gmra.mxu3 %vm108_vm2, %v1147_v44  ;;  %v406_v52 = vld [vmem:[%s2809_s1 + $0x108] sm:$0xff]  ;;  %v785_v53 = vld [vmem:[%s2810_s2 + $0x100] sm:$0xff] }
  0xef   :  { %v716_v3 = vmax.f32 %v336_v59, %v667_v60  ;;  %v1117_v59 = vld [vmem:[%s2811_s3 + $0x108] sm:$0xff] }
  0xf0   :  { %v1475_v58 = vmax.f32 %v715_v56, %v1426_v57  ;;  %v786_v57 = vld [vmem:[%s2810_s2 + $0x108] sm:$0xff] }
  0xf1   :  { %v941_v61 = vpop.f32.mrf.mxu2  ;;  %v1272_v62 = vpop.f32.mrf.mxu3 }
  0xf2   :  { %1525 = vst.msk [vmem:[%s2813_s6 + $0x58] sm:$0xff] %vm1513_vm3, %v1475_v58  ;;  %v942_v63 = vadd.f32 %v1970_v50, %v941_v61  ;;  %v1273_v0 = vadd.f32 %v1970_v50, %v1272_v62  ;;  %v232_v1 = vpop.f32.mrf.mxu0  ;;  %v563_v2 = vpop.f32.mrf.mxu1  ;;  %v1116_v58 = vld [vmem:[%s2811_s3 + $0x100] sm:$0xff] }
  0xf3   :  { %v233_v12 = vadd.f32 %v1970_v50, %v232_v1  ;;  %v564_v13 = vadd.f32 %v1970_v50, %v563_v2  ;;  %v818_v1 = vpack.c.bf16 %v786_v57, %v785_v53  ;;  %v1149_v2 = vpack.c.bf16 %v1117_v59, %v1116_v58 }
  0xf4   :  { %v1047_v4 = vmax.f32 %v942_v63, 0.0  ;;  %v1378_v5 = vmax.f32 %v1273_v0, 0.0  ;;  %v96_v63 = vpack.c.bf16 %v64_v49, %v63_v48  ;;  %v438_v0 = vpack.c.bf16 %v406_v52, %v405_v51 }
  0xf5   :  { %v337_v24 = vmax.f32 %v233_v12, 0.0  ;;  %v668_v25 = vmax.f32 %v564_v13, 0.0 }
  0xf6   :  { %v1427_v11 = vmax.f32 %v1047_v4, %v1378_v5 }
  0xf7   :  { %v717_v34 = vmax.f32 %v337_v24, %v668_v25 }
  0xf8   :  { %v1476_v17 = vmax.f32 %v716_v3, %v1427_v11 }
  0xf9   :  { %v943_v18 = vpop.f32.mrf.mxu2  ;;  %v1274_v19 = vpop.f32.mrf.mxu3 }
  0xfa   :  { %1526 = vst.msk [vmem:[%s2813_s6 + $0x60] sm:$0xff] %vm1513_vm3, %v1476_v17  ;;  %v944_v26 = vadd.f32 %v1970_v50, %v943_v18  ;;  %v1275_v27 = vadd.f32 %v1970_v50, %v1274_v19  ;;  %v235_v28 = vpop.f32.mrf.mxu0  ;;  %v566_v29 = vpop.f32.mrf.mxu1 }
  0xfb   :  { %v236_v32 = vadd.f32 %v1970_v50, %v235_v28  ;;  %v567_v33 = vadd.f32 %v1970_v50, %v566_v29  ;;  %v66_v28 = vld [vmem:[%s2808_s0 + $0x118] sm:$0xff]  ;;  %v407_v29 = vld [vmem:[%s2809_s1 + $0x110] sm:$0xff] }
  0xfc   :  { %v1048_v30 = vmax.f32 %v944_v26, 0.0  ;;  %v1379_v31 = vmax.f32 %v1275_v27, 0.0  ;;  %v65_v27 = vld [vmem:[%s2808_s0 + $0x110] sm:$0xff] }
  0xfd   :  { %1582 = vmatmul.msk.bf16.gmra.mxu0 %vm108_vm2, %v95_v20  ;;  %1607 = vmatmul.msk.bf16.gmra.mxu1 %vm108_vm2, %v437_v21  ;;  %v338_v37 = vmax.f32 %v236_v32, 0.0  ;;  %v669_v38 = vmax.f32 %v567_v33, 0.0 }
  0xfe   :  { %v1428_v35 = vmax.f32 %v1048_v30, %v1379_v31  ;;  %1632 = vmatmul.msk.bf16.gmra.mxu2 %vm108_vm2, %v817_v22  ;;  %1657 = vmatmul.msk.bf16.gmra.mxu3 %vm108_vm2, %v1148_v23  ;;  %v408_v30 = vld [vmem:[%s2809_s1 + $0x118] sm:$0xff]  ;;  %v787_v31 = vld [vmem:[%s2810_s2 + $0x110] sm:$0xff] }
  0xff   :  { %v718_v45 = vmax.f32 %v338_v37, %v669_v38  ;;  %v1119_v37 = vld [vmem:[%s2811_s3 + $0x118] sm:$0xff] }
 0x100   :  { %v1477_v36 = vmax.f32 %v717_v34, %v1428_v35  ;;  %v788_v35 = vld [vmem:[%s2810_s2 + $0x118] sm:$0xff] }
 0x101   :  { %v946_v39 = vpop.f32.mrf.mxu2  ;;  %v1277_v40 = vpop.f32.mrf.mxu3 }
 0x102   :  { %1527 = vst.msk [vmem:[%s2813_s6 + $0x68] sm:$0xff] %vm1513_vm3, %v1477_v36  ;;  %v947_v41 = vadd.f32 %v1970_v50, %v946_v39  ;;  %v1278_v42 = vadd.f32 %v1970_v50, %v1277_v40  ;;  %v237_v43 = vpop.f32.mrf.mxu0  ;;  %v568_v44 = vpop.f32.mrf.mxu1  ;;  %v1118_v36 = vld [vmem:[%s2811_s3 + $0x110] sm:$0xff] }
 0x103   :  { %v238_v55 = vadd.f32 %v1970_v50, %v237_v43  ;;  %v569_v56 = vadd.f32 %v1970_v50, %v568_v44  ;;  %v819_v43 = vpack.c.bf16 %v788_v35, %v787_v31  ;;  %v1150_v44 = vpack.c.bf16 %v1119_v37, %v1118_v36 }
 0x104   :  { %v1049_v46 = vmax.f32 %v947_v41, 0.0  ;;  %v1380_v47 = vmax.f32 %v1278_v42, 0.0  ;;  %v97_v41 = vpack.c.bf16 %v66_v28, %v65_v27  ;;  %v439_v42 = vpack.c.bf16 %v408_v30, %v407_v29 }
 0x105   :  { %v339_v3 = vmax.f32 %v238_v55, 0.0  ;;  %v670_v4 = vmax.f32 %v569_v56, 0.0 }
 0x106   :  { %v1429_v54 = vmax.f32 %v1049_v46, %v1380_v47 }
 0x107   :  { %v719_v13 = vmax.f32 %v339_v3, %v670_v4 }
 0x108   :  { %v1478_v60 = vmax.f32 %v718_v45, %v1429_v54 }
 0x109   :  { %v948_v61 = vpop.f32.mrf.mxu2  ;;  %v1279_v62 = vpop.f32.mrf.mxu3 }
 0x10a   :  { %1528 = vst.msk [vmem:[%s2813_s6 + $0x70] sm:$0xff] %vm1513_vm3, %v1478_v60  ;;  %v949_v5 = vadd.f32 %v1970_v50, %v948_v61  ;;  %v1280_v6 = vadd.f32 %v1970_v50, %v1279_v62  ;;  %v240_v7 = vpop.f32.mrf.mxu0  ;;  %v571_v8 = vpop.f32.mrf.mxu1 }
 0x10b   :  { %v241_v11 = vadd.f32 %v1970_v50, %v240_v7  ;;  %v572_v12 = vadd.f32 %v1970_v50, %v571_v8  ;;  %v68_v7 = vld [vmem:[%s2808_s0 + $0x128] sm:$0xff]  ;;  %v409_v8 = vld [vmem:[%s2809_s1 + $0x120] sm:$0xff] }
 0x10c   :  { %v1050_v9 = vmax.f32 %v949_v5, 0.0  ;;  %v1381_v10 = vmax.f32 %v1280_v6, 0.0  ;;  %v67_v6 = vld [vmem:[%s2808_s0 + $0x120] sm:$0xff] }
 0x10d   :  { %1583 = vmatmul.msk.bf16.gmra.mxu0 %vm108_vm2, %v96_v63  ;;  %1608 = vmatmul.msk.bf16.gmra.mxu1 %vm108_vm2, %v438_v0  ;;  %v340_v16 = vmax.f32 %v241_v11, 0.0  ;;  %v671_v17 = vmax.f32 %v572_v12, 0.0 }
 0x10e   :  { %v1430_v14 = vmax.f32 %v1050_v9, %v1381_v10  ;;  %1633 = vmatmul.msk.bf16.gmra.mxu2 %vm108_vm2, %v818_v1  ;;  %1658 = vmatmul.msk.bf16.gmra.mxu3 %vm108_vm2, %v1149_v2  ;;  %v410_v9 = vld [vmem:[%s2809_s1 + $0x128] sm:$0xff]  ;;  %v789_v10 = vld [vmem:[%s2810_s2 + $0x120] sm:$0xff] }
 0x10f   :  { %v720_v24 = vmax.f32 %v340_v16, %v671_v17  ;;  %v1121_v16 = vld [vmem:[%s2811_s3 + $0x128] sm:$0xff] }
 0x110   :  { %v1479_v15 = vmax.f32 %v719_v13, %v1430_v14  ;;  %v790_v14 = vld [vmem:[%s2810_s2 + $0x128] sm:$0xff] }
 0x111   :  { %v951_v18 = vpop.f32.mrf.mxu2  ;;  %v1282_v19 = vpop.f32.mrf.mxu3 }
 0x112   :  { %1529 = vst.msk [vmem:[%s2813_s6 + $0x78] sm:$0xff] %vm1513_vm3, %v1479_v15  ;;  %v952_v20 = vadd.f32 %v1970_v50, %v951_v18  ;;  %v1283_v21 = vadd.f32 %v1970_v50, %v1282_v19  ;;  %v242_v22 = vpop.f32.mrf.mxu0  ;;  %v573_v23 = vpop.f32.mrf.mxu1  ;;  %v1120_v15 = vld [vmem:[%s2811_s3 + $0x120] sm:$0xff] }
 0x113   :  { %v243_v33 = vadd.f32 %v1970_v50, %v242_v22  ;;  %v574_v34 = vadd.f32 %v1970_v50, %v573_v23  ;;  %v820_v22 = vpack.c.bf16 %v790_v14, %v789_v10  ;;  %v1151_v23 = vpack.c.bf16 %v1121_v16, %v1120_v15 }
 0x114   :  { %v1051_v25 = vmax.f32 %v952_v20, 0.0  ;;  %v1382_v26 = vmax.f32 %v1283_v21, 0.0  ;;  %v98_v20 = vpack.c.bf16 %v68_v7, %v67_v6  ;;  %v440_v21 = vpack.c.bf16 %v410_v9, %v409_v8 }
 0x115   :  { %v341_v45 = vmax.f32 %v243_v33, 0.0  ;;  %v672_v46 = vmax.f32 %v574_v34, 0.0 }
 0x116   :  { %v1431_v32 = vmax.f32 %v1051_v25, %v1382_v26 }
 0x117   :  { %v721_v56 = vmax.f32 %v341_v45, %v672_v46 }
 0x118   :  { %v1480_v38 = vmax.f32 %v720_v24, %v1431_v32 }
 0x119   :  { %v953_v39 = vpop.f32.mrf.mxu2  ;;  %v1284_v40 = vpop.f32.mrf.mxu3 }
 0x11a   :  { %1530 = vst.msk [vmem:[%s2813_s6 + $0x80] sm:$0xff] %vm1513_vm3, %v1480_v38  ;;  %v954_v47 = vadd.f32 %v1970_v50, %v953_v39  ;;  %v1285_v48 = vadd.f32 %v1970_v50, %v1284_v40  ;;  %v245_v49 = vpop.f32.mrf.mxu0  ;;  %v576_v51 = vpop.f32.mrf.mxu1 }
 0x11b   :  { %v246_v54 = vadd.f32 %v1970_v50, %v245_v49  ;;  %v577_v55 = vadd.f32 %v1970_v50, %v576_v51  ;;  %v70_v49 = vld [vmem:[%s2808_s0 + $0x138] sm:$0xff]  ;;  %v411_v51 = vld [vmem:[%s2809_s1 + $0x130] sm:$0xff] }
 0x11c   :  { %v1052_v52 = vmax.f32 %v954_v47, 0.0  ;;  %v1383_v53 = vmax.f32 %v1285_v48, 0.0  ;;  %v69_v48 = vld [vmem:[%s2808_s0 + $0x130] sm:$0xff] }
 0x11d   :  { %1584 = vmatmul.msk.bf16.gmra.mxu0 %vm108_vm2, %v97_v41  ;;  %1609 = vmatmul.msk.bf16.gmra.mxu1 %vm108_vm2, %v439_v42  ;;  %v342_v59 = vmax.f32 %v246_v54, 0.0  ;;  %v673_v60 = vmax.f32 %v577_v55, 0.0  ;;  %v2438_v54 = vld [vmem:[%s2812_s5] ss:$0 sm:$0xff] }
 0x11e   :  { %v1432_v57 = vmax.f32 %v1052_v52, %v1383_v53  ;;  %1634 = vmatmul.msk.bf16.gmra.mxu2 %vm108_vm2, %v819_v43  ;;  %1659 = vmatmul.msk.bf16.gmra.mxu3 %vm108_vm2, %v1150_v44  ;;  %v791_v52 = vld [vmem:[%s2810_s2 + $0x130] sm:$0xff] }
 0x11f   :  { %v722_v3 = vmax.f32 %v342_v59, %v673_v60  ;;  %v1123_v59 = vld [vmem:[%s2811_s3 + $0x138] sm:$0xff] }
 0x120   :  { %v1481_v58 = vmax.f32 %v721_v56, %v1432_v57  ;;  %v792_v57 = vld [vmem:[%s2810_s2 + $0x138] sm:$0xff] }
 0x121   :  { %v956_v61 = vpop.f32.mrf.mxu2  ;;  %v1287_v62 = vpop.f32.mrf.mxu3 }
 0x122   :  { %1531 = vst.msk [vmem:[%s2813_s6 + $0x88] sm:$0xff] %vm1513_vm3, %v1481_v58  ;;  %v957_v63 = vadd.f32 %v1970_v50, %v956_v61  ;;  %v1288_v0 = vadd.f32 %v1970_v50, %v1287_v62  ;;  %v247_v1 = vpop.f32.mrf.mxu0  ;;  %v578_v2 = vpop.f32.mrf.mxu1  ;;  %v1122_v58 = vld [vmem:[%s2811_s3 + $0x130] sm:$0xff] }
 0x123   :  { %v248_v12 = vadd.f32 %v1970_v50, %v247_v1  ;;  %v579_v13 = vadd.f32 %v1970_v50, %v578_v2  ;;  %v821_v1 = vpack.c.bf16 %v792_v57, %v791_v52  ;;  %v1152_v2 = vpack.c.bf16 %v1123_v59, %v1122_v58 }
 0x124   :  { %v1053_v4 = vmax.f32 %v957_v63, 0.0  ;;  %v1384_v5 = vmax.f32 %v1288_v0, 0.0  ;;  %v99_v63 = vpack.c.bf16 %v70_v49, %v69_v48 }
 0x125   :  { %v343_v24 = vmax.f32 %v248_v12, 0.0  ;;  %v674_v25 = vmax.f32 %v579_v13, 0.0 }
 0x126   :  { %v1433_v11 = vmax.f32 %v1053_v4, %v1384_v5 }
 0x127   :  { %v723_v34 = vmax.f32 %v343_v24, %v674_v25 }
 0x128   :  { %v1482_v17 = vmax.f32 %v722_v3, %v1433_v11 }
 0x129   :  { %v958_v18 = vpop.f32.mrf.mxu2  ;;  %v1289_v19 = vpop.f32.mrf.mxu3 }
 0x12a   :  { %1532 = vst.msk [vmem:[%s2813_s6 + $0x90] sm:$0xff] %vm1513_vm3, %v1482_v17  ;;  %v959_v26 = vadd.f32 %v1970_v50, %v958_v18  ;;  %v1290_v27 = vadd.f32 %v1970_v50, %v1289_v19  ;;  %v250_v28 = vpop.f32.mrf.mxu0  ;;  %v581_v29 = vpop.f32.mrf.mxu1 }
 0x12b   :  { %v251_v32 = vadd.f32 %v1970_v50, %v250_v28  ;;  %v582_v33 = vadd.f32 %v1970_v50, %v581_v29  ;;  %v72_v28 = vld [vmem:[%s2808_s0 + $0x148] sm:$0xff]  ;;  %v413_v29 = vld [vmem:[%s2809_s1 + $0x140] sm:$0xff] }
 0x12c   :  { %v1054_v30 = vmax.f32 %v959_v26, 0.0  ;;  %v1385_v31 = vmax.f32 %v1290_v27, 0.0  ;;  %v71_v27 = vld [vmem:[%s2808_s0 + $0x140] sm:$0xff] }
 0x12d   :  { %1585 = vmatmul.msk.bf16.gmra.mxu0 %vm108_vm2, %v98_v20  ;;  %1610 = vmatmul.msk.bf16.gmra.mxu1 %vm108_vm2, %v440_v21  ;;  %v344_v37 = vmax.f32 %v251_v32, 0.0  ;;  %v675_v38 = vmax.f32 %v582_v33, 0.0 }
 0x12e   :  { %v1434_v35 = vmax.f32 %v1054_v30, %v1385_v31  ;;  %1635 = vmatmul.msk.bf16.gmra.mxu2 %vm108_vm2, %v820_v22  ;;  %1660 = vmatmul.msk.bf16.gmra.mxu3 %vm108_vm2, %v1151_v23  ;;  %v414_v30 = vld [vmem:[%s2809_s1 + $0x148] sm:$0xff]  ;;  %v793_v31 = vld [vmem:[%s2810_s2 + $0x140] sm:$0xff] }
 0x12f   :  { %v724_v45 = vmax.f32 %v344_v37, %v675_v38  ;;  %v1125_v37 = vld [vmem:[%s2811_s3 + $0x148] sm:$0xff] }
 0x130   :  { %v1483_v36 = vmax.f32 %v723_v34, %v1434_v35  ;;  %v794_v35 = vld [vmem:[%s2810_s2 + $0x148] sm:$0xff] }
 0x131   :  { %v961_v39 = vpop.f32.mrf.mxu2  ;;  %v1292_v40 = vpop.f32.mrf.mxu3 }
 0x132   :  { %1533 = vst.msk [vmem:[%s2813_s6 + $0x98] sm:$0xff] %vm1513_vm3, %v1483_v36  ;;  %v962_v41 = vadd.f32 %v1970_v50, %v961_v39  ;;  %v1293_v42 = vadd.f32 %v1970_v50, %v1292_v40  ;;  %v252_v43 = vpop.f32.mrf.mxu0  ;;  %v583_v44 = vpop.f32.mrf.mxu1  ;;  %v412_v50 = vld [vmem:[%s2809_s1 + $0x138] sm:$0xff]  ;;  %v1124_v36 = vld [vmem:[%s2811_s3 + $0x140] sm:$0xff] }
 0x133   :  { %v253_v55 = vadd.f32 %v2438_v54, %v252_v43  ;;  %v584_v56 = vadd.f32 %v2438_v54, %v583_v44  ;;  %v441_v0 = vpack.c.bf16 %v412_v50, %v411_v51  ;;  %v822_v43 = vpack.c.bf16 %v794_v35, %v793_v31 }
 0x134   :  { %v1055_v46 = vmax.f32 %v962_v41, 0.0  ;;  %v1386_v47 = vmax.f32 %v1293_v42, 0.0  ;;  %v100_v41 = vpack.c.bf16 %v72_v28, %v71_v27  ;;  %v442_v42 = vpack.c.bf16 %v414_v30, %v413_v29 }
 0x135   :  { %v345_v3 = vmax.f32 %v253_v55, 0.0  ;;  %v676_v4 = vmax.f32 %v584_v56, 0.0  ;;  %v1153_v44 = vpack.c.bf16 %v1125_v37, %v1124_v36 }
 0x136   :  { %v1435_v53 = vmax.f32 %v1055_v46, %v1386_v47 }
 0x137   :  { %v725_v13 = vmax.f32 %v345_v3, %v676_v4 }
 0x138   :  { %v1484_v60 = vmax.f32 %v724_v45, %v1435_v53 }
 0x139   :  { %v963_v61 = vpop.f32.mrf.mxu2  ;;  %v1294_v62 = vpop.f32.mrf.mxu3 }
 0x13a   :  { %1534 = vst.msk [vmem:[%s2813_s6 + $0xa0] sm:$0xff] %vm1513_vm3, %v1484_v60  ;;  %v964_v5 = vadd.f32 %v2438_v54, %v963_v61  ;;  %v1295_v6 = vadd.f32 %v2438_v54, %v1294_v62  ;;  %v255_v7 = vpop.f32.mrf.mxu0  ;;  %v586_v8 = vpop.f32.mrf.mxu1 }
 0x13b   :  { %v256_v11 = vadd.f32 %v2438_v54, %v255_v7  ;;  %v587_v12 = vadd.f32 %v2438_v54, %v586_v8  ;;  %v74_v7 = vld [vmem:[%s2808_s0 + $0x158] sm:$0xff]  ;;  %v415_v8 = vld [vmem:[%s2809_s1 + $0x150] sm:$0xff] }
 0x13c   :  { %v1056_v9 = vmax.f32 %v964_v5, 0.0  ;;  %v1387_v10 = vmax.f32 %v1295_v6, 0.0  ;;  %v73_v6 = vld [vmem:[%s2808_s0 + $0x150] sm:$0xff] }
 0x13d   :  { %1586 = vmatmul.msk.bf16.gmra.mxu0 %vm108_vm2, %v99_v63  ;;  %1611 = vmatmul.msk.bf16.gmra.mxu1 %vm108_vm2, %v441_v0  ;;  %v346_v16 = vmax.f32 %v256_v11, 0.0  ;;  %v677_v17 = vmax.f32 %v587_v12, 0.0 }
 0x13e   :  { %v1436_v14 = vmax.f32 %v1056_v9, %v1387_v10  ;;  %1636 = vmatmul.msk.bf16.gmra.mxu2 %vm108_vm2, %v821_v1  ;;  %1661 = vmatmul.msk.bf16.gmra.mxu3 %vm108_vm2, %v1152_v2  ;;  %v416_v9 = vld [vmem:[%s2809_s1 + $0x158] sm:$0xff]  ;;  %v795_v10 = vld [vmem:[%s2810_s2 + $0x150] sm:$0xff] }
 0x13f   :  { %v726_v24 = vmax.f32 %v346_v16, %v677_v17  ;;  %v1127_v16 = vld [vmem:[%s2811_s3 + $0x158] sm:$0xff] }
 0x140   :  { %v1485_v15 = vmax.f32 %v725_v13, %v1436_v14  ;;  %v796_v14 = vld [vmem:[%s2810_s2 + $0x158] sm:$0xff] }
 0x141   :  { %v966_v18 = vpop.f32.mrf.mxu2  ;;  %v1297_v19 = vpop.f32.mrf.mxu3 }
 0x142   :  { %1535 = vst.msk [vmem:[%s2813_s6 + $0xa8] sm:$0xff] %vm1513_vm3, %v1485_v15  ;;  %v967_v20 = vadd.f32 %v2438_v54, %v966_v18  ;;  %v1298_v21 = vadd.f32 %v2438_v54, %v1297_v19  ;;  %v257_v22 = vpop.f32.mrf.mxu0  ;;  %v588_v23 = vpop.f32.mrf.mxu1  ;;  %v1126_v15 = vld [vmem:[%s2811_s3 + $0x150] sm:$0xff] }
 0x143   :  { %v258_v33 = vadd.f32 %v2438_v54, %v257_v22  ;;  %v589_v34 = vadd.f32 %v2438_v54, %v588_v23  ;;  %v823_v22 = vpack.c.bf16 %v796_v14, %v795_v10  ;;  %v1154_v23 = vpack.c.bf16 %v1127_v16, %v1126_v15 }
 0x144   :  { %v1057_v25 = vmax.f32 %v967_v20, 0.0  ;;  %v1388_v26 = vmax.f32 %v1298_v21, 0.0  ;;  %v101_v20 = vpack.c.bf16 %v74_v7, %v73_v6  ;;  %v443_v21 = vpack.c.bf16 %v416_v9, %v415_v8 }
 0x145   :  { %v347_v45 = vmax.f32 %v258_v33, 0.0  ;;  %v678_v46 = vmax.f32 %v589_v34, 0.0 }
 0x146   :  { %v1437_v32 = vmax.f32 %v1057_v25, %v1388_v26 }
 0x147   :  { %v727_v56 = vmax.f32 %v347_v45, %v678_v46 }
 0x148   :  { %v1486_v38 = vmax.f32 %v726_v24, %v1437_v32 }
 0x149   :  { %v968_v39 = vpop.f32.mrf.mxu2  ;;  %v1299_v40 = vpop.f32.mrf.mxu3 }
 0x14a   :  { %1536 = vst.msk [vmem:[%s2813_s6 + $0xb0] sm:$0xff] %vm1513_vm3, %v1486_v38  ;;  %v969_v47 = vadd.f32 %v2438_v54, %v968_v39  ;;  %v1300_v48 = vadd.f32 %v2438_v54, %v1299_v40  ;;  %v260_v49 = vpop.f32.mrf.mxu0  ;;  %v591_v51 = vpop.f32.mrf.mxu1 }
 0x14b   :  { %v261_v53 = vadd.f32 %v2438_v54, %v260_v49  ;;  %v592_v55 = vadd.f32 %v2438_v54, %v591_v51  ;;  %v76_v49 = vld [vmem:[%s2808_s0 + $0x168] sm:$0xff]  ;;  %v417_v51 = vld [vmem:[%s2809_s1 + $0x160] sm:$0xff] }
 0x14c   :  { %v1058_v50 = vmax.f32 %v969_v47, 0.0  ;;  %v1389_v52 = vmax.f32 %v1300_v48, 0.0  ;;  %v75_v48 = vld [vmem:[%s2808_s0 + $0x160] sm:$0xff] }
 0x14d   :  { %1587 = vmatmul.msk.bf16.gmra.mxu0 %vm108_vm2, %v100_v41  ;;  %1612 = vmatmul.msk.bf16.gmra.mxu1 %vm108_vm2, %v442_v42  ;;  %v348_v59 = vmax.f32 %v261_v53, 0.0  ;;  %v679_v60 = vmax.f32 %v592_v55, 0.0 }
 0x14e   :  { %v1438_v57 = vmax.f32 %v1058_v50, %v1389_v52  ;;  %1637 = vmatmul.msk.bf16.gmra.mxu2 %vm108_vm2, %v822_v43  ;;  %1662 = vmatmul.msk.bf16.gmra.mxu3 %vm108_vm2, %v1153_v44  ;;  %v418_v50 = vld [vmem:[%s2809_s1 + $0x168] sm:$0xff]  ;;  %v797_v52 = vld [vmem:[%s2810_s2 + $0x160] sm:$0xff] }
 0x14f   :  { %v728_v3 = vmax.f32 %v348_v59, %v679_v60  ;;  %v1129_v59 = vld [vmem:[%s2811_s3 + $0x168] sm:$0xff] }
 0x150   :  { %v1487_v58 = vmax.f32 %v727_v56, %v1438_v57  ;;  %v798_v57 = vld [vmem:[%s2810_s2 + $0x168] sm:$0xff] }
 0x151   :  { %v971_v61 = vpop.f32.mrf.mxu2  ;;  %v1302_v62 = vpop.f32.mrf.mxu3 }
 0x152   :  { %1537 = vst.msk [vmem:[%s2813_s6 + $0xb8] sm:$0xff] %vm1513_vm3, %v1487_v58  ;;  %v972_v63 = vadd.f32 %v2438_v54, %v971_v61  ;;  %v1303_v0 = vadd.f32 %v2438_v54, %v1302_v62  ;;  %v262_v1 = vpop.f32.mrf.mxu0  ;;  %v593_v2 = vpop.f32.mrf.mxu1  ;;  %v1128_v58 = vld [vmem:[%s2811_s3 + $0x160] sm:$0xff] }
 0x153   :  { %v263_v12 = vadd.f32 %v2438_v54, %v262_v1  ;;  %v594_v13 = vadd.f32 %v2438_v54, %v593_v2  ;;  %v824_v1 = vpack.c.bf16 %v798_v57, %v797_v52  ;;  %v1155_v2 = vpack.c.bf16 %v1129_v59, %v1128_v58 }
 0x154   :  { %v1059_v4 = vmax.f32 %v972_v63, 0.0  ;;  %v1390_v5 = vmax.f32 %v1303_v0, 0.0  ;;  %v102_v63 = vpack.c.bf16 %v76_v49, %v75_v48  ;;  %v444_v0 = vpack.c.bf16 %v418_v50, %v417_v51 }
 0x155   :  { %v349_v24 = vmax.f32 %v263_v12, 0.0  ;;  %v680_v25 = vmax.f32 %v594_v13, 0.0 }
 0x156   :  { %v1439_v11 = vmax.f32 %v1059_v4, %v1390_v5 }
 0x157   :  { %v729_v34 = vmax.f32 %v349_v24, %v680_v25 }
 0x158   :  { %v1488_v17 = vmax.f32 %v728_v3, %v1439_v11 }
 0x159   :  { %v973_v18 = vpop.f32.mrf.mxu2  ;;  %v1304_v19 = vpop.f32.mrf.mxu3 }
 0x15a   :  { %1538 = vst.msk [vmem:[%s2813_s6 + $0xc0] sm:$0xff] %vm1513_vm3, %v1488_v17  ;;  %v974_v26 = vadd.f32 %v2438_v54, %v973_v18  ;;  %v1305_v27 = vadd.f32 %v2438_v54, %v1304_v19  ;;  %v265_v28 = vpop.f32.mrf.mxu0  ;;  %v596_v29 = vpop.f32.mrf.mxu1 }
 0x15b   :  { %v266_v32 = vadd.f32 %v2438_v54, %v265_v28  ;;  %v597_v33 = vadd.f32 %v2438_v54, %v596_v29  ;;  %v78_v28 = vld [vmem:[%s2808_s0 + $0x178] sm:$0xff]  ;;  %v419_v29 = vld [vmem:[%s2809_s1 + $0x170] sm:$0xff] }
 0x15c   :  { %v1060_v30 = vmax.f32 %v974_v26, 0.0  ;;  %v1391_v31 = vmax.f32 %v1305_v27, 0.0  ;;  %v77_v27 = vld [vmem:[%s2808_s0 + $0x170] sm:$0xff] }
 0x15d   :  { %1588 = vmatmul.msk.bf16.gmra.mxu0 %vm108_vm2, %v101_v20  ;;  %1613 = vmatmul.msk.bf16.gmra.mxu1 %vm108_vm2, %v443_v21  ;;  %v350_v37 = vmax.f32 %v266_v32, 0.0  ;;  %v681_v38 = vmax.f32 %v597_v33, 0.0 }
 0x15e   :  { %v1440_v35 = vmax.f32 %v1060_v30, %v1391_v31  ;;  %1638 = vmatmul.msk.bf16.gmra.mxu2 %vm108_vm2, %v823_v22  ;;  %1663 = vmatmul.msk.bf16.gmra.mxu3 %vm108_vm2, %v1154_v23  ;;  %v420_v30 = vld [vmem:[%s2809_s1 + $0x178] sm:$0xff]  ;;  %v799_v31 = vld [vmem:[%s2810_s2 + $0x170] sm:$0xff] }
 0x15f   :  { %v730_v45 = vmax.f32 %v350_v37, %v681_v38  ;;  %v1131_v37 = vld [vmem:[%s2811_s3 + $0x178] sm:$0xff] }
 0x160   :  { %v1489_v36 = vmax.f32 %v729_v34, %v1440_v35  ;;  %v800_v35 = vld [vmem:[%s2810_s2 + $0x178] sm:$0xff] }
 0x161   :  { %v976_v39 = vpop.f32.mrf.mxu2  ;;  %v1307_v40 = vpop.f32.mrf.mxu3 }
 0x162   :  { %1539 = vst.msk [vmem:[%s2813_s6 + $0xc8] sm:$0xff] %vm1513_vm3, %v1489_v36  ;;  %v977_v41 = vadd.f32 %v2438_v54, %v976_v39  ;;  %v1308_v42 = vadd.f32 %v2438_v54, %v1307_v40  ;;  %v267_v43 = vpop.f32.mrf.mxu0  ;;  %v598_v44 = vpop.f32.mrf.mxu1  ;;  %v1130_v36 = vld [vmem:[%s2811_s3 + $0x170] sm:$0xff] }
 0x163   :  { %v268_v55 = vadd.f32 %v2438_v54, %v267_v43  ;;  %v599_v56 = vadd.f32 %v2438_v54, %v598_v44  ;;  %v825_v43 = vpack.c.bf16 %v800_v35, %v799_v31  ;;  %v1156_v44 = vpack.c.bf16 %v1131_v37, %v1130_v36 }
 0x164   :  { %v1061_v46 = vmax.f32 %v977_v41, 0.0  ;;  %v1392_v47 = vmax.f32 %v1308_v42, 0.0  ;;  %v103_v41 = vpack.c.bf16 %v78_v28, %v77_v27  ;;  %v445_v42 = vpack.c.bf16 %v420_v30, %v419_v29 }
 0x165   :  { %v351_v3 = vmax.f32 %v268_v55, 0.0  ;;  %v682_v4 = vmax.f32 %v599_v56, 0.0 }
 0x166   :  { %v1441_v53 = vmax.f32 %v1061_v46, %v1392_v47 }
 0x167   :  { %v731_v13 = vmax.f32 %v351_v3, %v682_v4 }
 0x168   :  { %v1490_v60 = vmax.f32 %v730_v45, %v1441_v53 }
 0x169   :  { %v978_v61 = vpop.f32.mrf.mxu2  ;;  %v1309_v62 = vpop.f32.mrf.mxu3 }
 0x16a   :  { %1540 = vst.msk [vmem:[%s2813_s6 + $0xd0] sm:$0xff] %vm1513_vm3, %v1490_v60  ;;  %v979_v5 = vadd.f32 %v2438_v54, %v978_v61  ;;  %v1310_v6 = vadd.f32 %v2438_v54, %v1309_v62  ;;  %v270_v7 = vpop.f32.mrf.mxu0  ;;  %v601_v8 = vpop.f32.mrf.mxu1 }
 0x16b   :  { %v271_v11 = vadd.f32 %v2438_v54, %v270_v7  ;;  %v602_v12 = vadd.f32 %v2438_v54, %v601_v8 }
 0x16c   :  { %v1062_v9 = vmax.f32 %v979_v5, 0.0  ;;  %v1393_v10 = vmax.f32 %v1310_v6, 0.0  ;;  %v79_v6 = vld [vmem:[%s2808_s0 + $0x180] sm:$0xff] }
 0x16d   :  { %1589 = vmatmul.msk.bf16.gmra.mxu0 %vm108_vm2, %v102_v63  ;;  %1614 = vmatmul.msk.bf16.gmra.mxu1 %vm108_vm2, %v444_v0  ;;  %v352_v16 = vmax.f32 %v271_v11, 0.0  ;;  %v683_v17 = vmax.f32 %v602_v12, 0.0  ;;  %v801_v11 = vld [vmem:[%s2810_s2 + $0x180] sm:$0xff] }
 0x16e   :  { %v1442_v14 = vmax.f32 %v1062_v9, %v1393_v10  ;;  %1639 = vmatmul.msk.bf16.gmra.mxu2 %vm108_vm2, %v824_v1  ;;  %1664 = vmatmul.msk.bf16.gmra.mxu3 %vm108_vm2, %v1155_v2  ;;  %v421_v10 = vld [vmem:[%s2809_s1 + $0x180] sm:$0xff] }
 0x16f   :  { %v732_v24 = vmax.f32 %v352_v16, %v683_v17  ;;  %v1132_v12 = vld [vmem:[%s2811_s3 + $0x180] sm:$0xff]  ;;  %v104_v16 = vpack.c.bf16 %v79_v6, %v79_v6  ;;  %v446_v17 = vpack.c.bf16 %v421_v10, %v421_v10 }
 0x170   :  { %v1491_v15 = vmax.f32 %v731_v13, %v1442_v14 }
 0x171   :  { %v981_v18 = vpop.f32.mrf.mxu2  ;;  %v1312_v19 = vpop.f32.mrf.mxu3 }
 0x172   :  { %1541 = vst.msk [vmem:[%s2813_s6 + $0xd8] sm:$0xff] %vm1513_vm3, %v1491_v15  ;;  %v982_v20 = vadd.f32 %v2438_v54, %v981_v18  ;;  %v1313_v21 = vadd.f32 %v2438_v54, %v1312_v19  ;;  %v272_v22 = vpop.f32.mrf.mxu0  ;;  %v603_v23 = vpop.f32.mrf.mxu1  ;;  %v826_v18 = vpack.c.bf16 %v801_v11, %v801_v11  ;;  %v1157_v19 = vpack.c.bf16 %v1132_v12, %v1132_v12 }
 0x173   :  { %v273_v33 = vadd.f32 %v2438_v54, %v272_v22  ;;  %v604_v34 = vadd.f32 %v2438_v54, %v603_v23 }
 0x174   :  { %v1063_v25 = vmax.f32 %v982_v20, 0.0  ;;  %v1394_v26 = vmax.f32 %v1313_v21, 0.0 }
 0x175   :  { %v353_v45 = vmax.f32 %v273_v33, 0.0  ;;  %v684_v46 = vmax.f32 %v604_v34, 0.0 }
 0x176   :  { %v1443_v32 = vmax.f32 %v1063_v25, %v1394_v26 }
 0x177   :  { %v733_v56 = vmax.f32 %v353_v45, %v684_v46 }
 0x178   :  { %v1492_v38 = vmax.f32 %v732_v24, %v1443_v32 }
 0x179   :  { %v983_v39 = vpop.f32.mrf.mxu2  ;;  %v1314_v40 = vpop.f32.mrf.mxu3 }
 0x17a   :  { %1542 = vst.msk [vmem:[%s2813_s6 + $0xe0] sm:$0xff] %vm1513_vm3, %v1492_v38  ;;  %v984_v47 = vadd.f32 %v2438_v54, %v983_v39  ;;  %v1315_v48 = vadd.f32 %v2438_v54, %v1314_v40  ;;  %v275_v49 = vpop.f32.mrf.mxu0  ;;  %v606_v51 = vpop.f32.mrf.mxu1 }
 0x17b   :  { %v276_v53 = vadd.f32 %v2438_v54, %v275_v49  ;;  %v607_v55 = vadd.f32 %v2438_v54, %v606_v51 }
 0x17c   :  { %v1064_v50 = vmax.f32 %v984_v47, 0.0  ;;  %v1395_v52 = vmax.f32 %v1315_v48, 0.0 }
 0x17d   :  { %1590 = vmatmul.msk.bf16.gmra.mxu0 %vm108_vm2, %v103_v41  ;;  %1615 = vmatmul.msk.bf16.gmra.mxu1 %vm108_vm2, %v445_v42  ;;  %v354_v59 = vmax.f32 %v276_v53, 0.0  ;;  %v685_v60 = vmax.f32 %v607_v55, 0.0 }
 0x17e   :  { %v1444_v57 = vmax.f32 %v1064_v50, %v1395_v52  ;;  %1640 = vmatmul.msk.bf16.gmra.mxu2 %vm108_vm2, %v825_v43  ;;  %1665 = vmatmul.msk.bf16.gmra.mxu3 %vm108_vm2, %v1156_v44 }
 0x17f   :  { %v734_v3 = vmax.f32 %v354_v59, %v685_v60 }
 0x180   :  { %v1493_v58 = vmax.f32 %v733_v56, %v1444_v57 }
 0x181   :  { %v986_v61 = vpop.f32.mrf.mxu2  ;;  %v1317_v62 = vpop.f32.mrf.mxu3 }
 0x182   :  { %1543 = vst.msk [vmem:[%s2813_s6 + $0xe8] sm:$0xff] %vm1513_vm3, %v1493_v58  ;;  %v987_v63 = vadd.f32 %v2438_v54, %v986_v61  ;;  %v1318_v0 = vadd.f32 %v2438_v54, %v1317_v62  ;;  %v277_v1 = vpop.f32.mrf.mxu0  ;;  %v608_v2 = vpop.f32.mrf.mxu1 }
 0x183   :  { %v278_v8 = vadd.f32 %v2438_v54, %v277_v1  ;;  %v609_v9 = vadd.f32 %v2438_v54, %v608_v2 }
 0x184   :  { %v1065_v4 = vmax.f32 %v987_v63, 0.0  ;;  %v1396_v5 = vmax.f32 %v1318_v0, 0.0 }
 0x185   :  { %v355_v20 = vmax.f32 %v278_v8, 0.0  ;;  %v686_v21 = vmax.f32 %v609_v9, 0.0 }
 0x186   :  { %v1445_v7 = vmax.f32 %v1065_v4, %v1396_v5 }
 0x187   :  { %v735_v30 = vmax.f32 %v355_v20, %v686_v21 }
 0x188   :  { %v1494_v13 = vmax.f32 %v734_v3, %v1445_v7 }
 0x189   :  { %v988_v14 = vpop.f32.mrf.mxu2  ;;  %v1319_v15 = vpop.f32.mrf.mxu3 }
 0x18a   :  { %1544 = vst.msk [vmem:[%s2813_s6 + $0xf0] sm:$0xff] %vm1513_vm3, %v1494_v13  ;;  %v989_v22 = vadd.f32 %v2438_v54, %v988_v14  ;;  %v1320_v23 = vadd.f32 %v2438_v54, %v1319_v15  ;;  %v280_v24 = vpop.f32.mrf.mxu0  ;;  %v611_v25 = vpop.f32.mrf.mxu1 }
 0x18b   :  { %v281_v28 = vadd.f32 %v2438_v54, %v280_v24  ;;  %v612_v29 = vadd.f32 %v2438_v54, %v611_v25 }
 0x18c   :  { %v1066_v26 = vmax.f32 %v989_v22, 0.0  ;;  %v1397_v27 = vmax.f32 %v1320_v23, 0.0 }
 0x18d   :  { %1591 = vmatmul.msk.bf16.gmra.mxu0 %vm108_vm2, %v104_v16  ;;  %1616 = vmatmul.msk.bf16.gmra.mxu1 %vm108_vm2, %v446_v17  ;;  %v356_v33 = vmax.f32 %v281_v28, 0.0  ;;  %v687_v34 = vmax.f32 %v612_v29, 0.0 }
 0x18e   :  { %v1446_v31 = vmax.f32 %v1066_v26, %v1397_v27  ;;  %1641 = vmatmul.msk.bf16.gmra.mxu2 %vm108_vm2, %v826_v18  ;;  %1666 = vmatmul.msk.bf16.gmra.mxu3 %vm108_vm2, %v1157_v19 }
 0x18f   :  { %v736_v41 = vmax.f32 %v356_v33, %v687_v34 }
 0x190   :  { %v1495_v32 = vmax.f32 %v735_v30, %v1446_v31 }
 0x191   :  { %v991_v35 = vpop.f32.mrf.mxu2  ;;  %v1322_v36 = vpop.f32.mrf.mxu3 }
 0x192   :  { %1545 = vst.msk [vmem:[%s2813_s6 + $0xf8] sm:$0xff] %vm1513_vm3, %v1495_v32  ;;  %v992_v37 = vadd.f32 %v2438_v54, %v991_v35  ;;  %v1323_v38 = vadd.f32 %v2438_v54, %v1322_v36  ;;  %v282_v39 = vpop.f32.mrf.mxu0  ;;  %v613_v40 = vpop.f32.mrf.mxu1 }
 0x193   :  { %v283_v45 = vadd.f32 %v2438_v54, %v282_v39  ;;  %v614_v46 = vadd.f32 %v2438_v54, %v613_v40 }
 0x194   :  { %v1067_v42 = vmax.f32 %v992_v37, 0.0  ;;  %v1398_v43 = vmax.f32 %v1323_v38, 0.0 }
 0x195   :  { %v357_v51 = vmax.f32 %v283_v45, 0.0  ;;  %v688_v50 = vmax.f32 %v614_v46, 0.0 }
 0x196   :  { %v1447_v44 = vmax.f32 %v1067_v42, %v1398_v43 }
 0x197   :  { %v737_v61 = vmax.f32 %v357_v51, %v688_v50 }
 0x198   :  { %v1496_v47 = vmax.f32 %v736_v41, %v1447_v44 }
 0x199   :  { %v993_v48 = vpop.f32.mrf.mxu2  ;;  %v1324_v49 = vpop.f32.mrf.mxu3 }
 0x19a   :  { %1546 = vst.msk [vmem:[%s2813_s6 + $0x100] sm:$0xff] %vm1513_vm3, %v1496_v47  ;;  %v994_v52 = vadd.f32 %v2438_v54, %v993_v48  ;;  %v1325_v53 = vadd.f32 %v2438_v54, %v1324_v49  ;;  %v285_v55 = vpop.f32.mrf.mxu0  ;;  %v616_v56 = vpop.f32.mrf.mxu1 }
 0x19b   :  { %v286_v59 = vadd.f32 %v2438_v54, %v285_v55  ;;  %v617_v60 = vadd.f32 %v2438_v54, %v616_v56 }
 0x19c   :  { %v1068_v57 = vmax.f32 %v994_v52, 0.0  ;;  %v1399_v58 = vmax.f32 %v1325_v53, 0.0 }
 0x19d   :  { %v358_v0 = vmax.f32 %v286_v59, 0.0  ;;  %v689_v1 = vmax.f32 %v617_v60, 0.0 }
 0x19e   :  { %v1448_v62 = vmax.f32 %v1068_v57, %v1399_v58 }
 0x19f   :  { %v738_v8 = vmax.f32 %v358_v0, %v689_v1 }
 0x1a0   :  { %v1497_v63 = vmax.f32 %v737_v61, %v1448_v62 }
 0x1a1   :  { %v996_v2 = vpop.f32.mrf.mxu2  ;;  %v1327_v3 = vpop.f32.mrf.mxu3 }
 0x1a2   :  { %1547 = vst.msk [vmem:[%s2813_s6 + $0x108] sm:$0xff] %vm1513_vm3, %v1497_v63  ;;  %v997_v4 = vadd.f32 %v2438_v54, %v996_v2  ;;  %v1328_v5 = vadd.f32 %v2438_v54, %v1327_v3  ;;  %v287_v6 = vpop.f32.mrf.mxu0  ;;  %v618_v7 = vpop.f32.mrf.mxu1 }
 0x1a3   :  { %v288_v12 = vadd.f32 %v2438_v54, %v287_v6  ;;  %v619_v13 = vadd.f32 %v2438_v54, %v618_v7 }
 0x1a4   :  { %v1069_v9 = vmax.f32 %v997_v4, 0.0  ;;  %v1400_v10 = vmax.f32 %v1328_v5, 0.0 }
 0x1a5   :  { %v359_v17 = vmax.f32 %v288_v12, 0.0  ;;  %v690_v18 = vmax.f32 %v619_v13, 0.0 }
 0x1a6   :  { %v1449_v11 = vmax.f32 %v1069_v9, %v1400_v10 }
 0x1a7   :  { %v739_v27 = vmax.f32 %v359_v17, %v690_v18 }
 0x1a8   :  { %v1498_v14 = vmax.f32 %v738_v8, %v1449_v11 }
 0x1a9   :  { %v998_v15 = vpop.f32.mrf.mxu2  ;;  %v1329_v16 = vpop.f32.mrf.mxu3 }
 0x1aa   :  { %1548 = vst.msk [vmem:[%s2813_s6 + $0x110] sm:$0xff] %vm1513_vm3, %v1498_v14  ;;  %v999_v19 = vadd.f32 %v2438_v54, %v998_v15  ;;  %v1330_v20 = vadd.f32 %v2438_v54, %v1329_v16  ;;  %v290_v21 = vpop.f32.mrf.mxu0  ;;  %v621_v22 = vpop.f32.mrf.mxu1 }
 0x1ab   :  { %v291_v25 = vadd.f32 %v2438_v54, %v290_v21  ;;  %v622_v26 = vadd.f32 %v2438_v54, %v621_v22 }
 0x1ac   :  { %v1070_v23 = vmax.f32 %v999_v19, 0.0  ;;  %v1401_v24 = vmax.f32 %v1330_v20, 0.0 }
 0x1ad   :  { %v360_v30 = vmax.f32 %v291_v25, 0.0  ;;  %v691_v31 = vmax.f32 %v622_v26, 0.0 }
 0x1ae   :  { %v1450_v28 = vmax.f32 %v1070_v23, %v1401_v24 }
 0x1af   :  { %v740_v38 = vmax.f32 %v360_v30, %v691_v31 }
 0x1b0   :  { %v1499_v29 = vmax.f32 %v739_v27, %v1450_v28 }
 0x1b1   :  { %v1001_v32 = vpop.f32.mrf.mxu2  ;;  %v1332_v33 = vpop.f32.mrf.mxu3 }
 0x1b2   :  { %1549 = vst.msk [vmem:[%s2813_s6 + $0x118] sm:$0xff] %vm1513_vm3, %v1499_v29  ;;  %v1002_v34 = vadd.f32 %v2438_v54, %v1001_v32  ;;  %v1333_v35 = vadd.f32 %v2438_v54, %v1332_v33  ;;  %v292_v36 = vpop.f32.mrf.mxu0  ;;  %v623_v37 = vpop.f32.mrf.mxu1 }
 0x1b3   :  { %v293_v42 = vadd.f32 %v2438_v54, %v292_v36  ;;  %v624_v43 = vadd.f32 %v2438_v54, %v623_v37 }
 0x1b4   :  { %v1071_v39 = vmax.f32 %v1002_v34, 0.0  ;;  %v1402_v40 = vmax.f32 %v1333_v35, 0.0 }
 0x1b5   :  { %v361_v47 = vmax.f32 %v293_v42, 0.0  ;;  %v692_v48 = vmax.f32 %v624_v43, 0.0 }
 0x1b6   :  { %v1451_v41 = vmax.f32 %v1071_v39, %v1402_v40 }
 0x1b7   :  { %v741_v58 = vmax.f32 %v361_v47, %v692_v48 }
 0x1b8   :  { %v1500_v44 = vmax.f32 %v740_v38, %v1451_v41 }
 0x1b9   :  { %v1003_v45 = vpop.f32.mrf.mxu2  ;;  %v1334_v46 = vpop.f32.mrf.mxu3 }
 0x1ba   :  { %1550 = vst.msk [vmem:[%s2813_s6 + $0x120] sm:$0xff] %vm1513_vm3, %v1500_v44  ;;  %v1004_v49 = vadd.f32 %v2438_v54, %v1003_v45  ;;  %v1335_v51 = vadd.f32 %v2438_v54, %v1334_v46  ;;  %v295_v50 = vpop.f32.mrf.mxu0  ;;  %v626_v52 = vpop.f32.mrf.mxu1 }
 0x1bb   :  { %v296_v56 = vadd.f32 %v2438_v54, %v295_v50  ;;  %v627_v57 = vadd.f32 %v2438_v54, %v626_v52 }
 0x1bc   :  { %v1072_v53 = vmax.f32 %v1004_v49, 0.0  ;;  %v1403_v55 = vmax.f32 %v1335_v51, 0.0 }
 0x1bd   :  { %v362_v61 = vmax.f32 %v296_v56, 0.0  ;;  %v693_v62 = vmax.f32 %v627_v57, 0.0 }
 0x1be   :  { %v1452_v59 = vmax.f32 %v1072_v53, %v1403_v55 }
 0x1bf   :  { %v742_v5 = vmax.f32 %v362_v61, %v693_v62 }
 0x1c0   :  { %v1501_v60 = vmax.f32 %v741_v58, %v1452_v59 }
 0x1c1   :  { %v1006_v63 = vpop.f32.mrf.mxu2  ;;  %v1337_v0 = vpop.f32.mrf.mxu3 }
 0x1c2   :  { %1551 = vst.msk [vmem:[%s2813_s6 + $0x128] sm:$0xff] %vm1513_vm3, %v1501_v60  ;;  %v1007_v1 = vadd.f32 %v2438_v54, %v1006_v63  ;;  %v1338_v2 = vadd.f32 %v2438_v54, %v1337_v0  ;;  %v297_v3 = vpop.f32.mrf.mxu0  ;;  %v628_v4 = vpop.f32.mrf.mxu1 }
 0x1c3   :  { %v298_v9 = vadd.f32 %v2438_v54, %v297_v3  ;;  %v629_v10 = vadd.f32 %v2438_v54, %v628_v4 }
 0x1c4   :  { %v1073_v6 = vmax.f32 %v1007_v1, 0.0  ;;  %v1404_v7 = vmax.f32 %v1338_v2, 0.0 }
 0x1c5   :  { %v363_v14 = vmax.f32 %v298_v9, 0.0  ;;  %v694_v15 = vmax.f32 %v629_v10, 0.0 }
 0x1c6   :  { %v1453_v8 = vmax.f32 %v1073_v6, %v1404_v7 }
 0x1c7   :  { %v743_v24 = vmax.f32 %v363_v14, %v694_v15 }
 0x1c8   :  { %v1502_v11 = vmax.f32 %v742_v5, %v1453_v8 }
 0x1c9   :  { %v1008_v12 = vpop.f32.mrf.mxu2  ;;  %v1339_v13 = vpop.f32.mrf.mxu3 }
 0x1ca   :  { %1552 = vst.msk [vmem:[%s2813_s6 + $0x130] sm:$0xff] %vm1513_vm3, %v1502_v11  ;;  %v1009_v16 = vadd.f32 %v2438_v54, %v1008_v12  ;;  %v1340_v17 = vadd.f32 %v2438_v54, %v1339_v13  ;;  %v300_v18 = vpop.f32.mrf.mxu0  ;;  %v631_v19 = vpop.f32.mrf.mxu1 }
 0x1cb   :  { %v301_v22 = vadd.f32 %v2438_v54, %v300_v18  ;;  %v632_v23 = vadd.f32 %v2438_v54, %v631_v19 }
 0x1cc   :  { %v1074_v20 = vmax.f32 %v1009_v16, 0.0  ;;  %v1405_v21 = vmax.f32 %v1340_v17, 0.0 }
 0x1cd   :  { %v364_v27 = vmax.f32 %v301_v22, 0.0  ;;  %v695_v28 = vmax.f32 %v632_v23, 0.0 }
 0x1ce   :  { %v1454_v25 = vmax.f32 %v1074_v20, %v1405_v21 }
 0x1cf   :  { %v744_v35 = vmax.f32 %v364_v27, %v695_v28 }
 0x1d0   :  { %v1503_v26 = vmax.f32 %v743_v24, %v1454_v25 }
 0x1d1   :  { %v1011_v29 = vpop.f32.mrf.mxu2  ;;  %v1342_v30 = vpop.f32.mrf.mxu3 }
 0x1d2   :  { %1553 = vst.msk [vmem:[%s2813_s6 + $0x138] sm:$0xff] %vm1513_vm3, %v1503_v26  ;;  %v1012_v31 = vadd.f32 %v2438_v54, %v1011_v29  ;;  %v1343_v32 = vadd.f32 %v2438_v54, %v1342_v30  ;;  %v302_v33 = vpop.f32.mrf.mxu0  ;;  %v633_v34 = vpop.f32.mrf.mxu1 }
 0x1d3   :  { %v303_v39 = vadd.f32 %v2438_v54, %v302_v33  ;;  %v634_v40 = vadd.f32 %v2438_v54, %v633_v34 }
 0x1d4   :  { %v1075_v36 = vmax.f32 %v1012_v31, 0.0  ;;  %v1406_v37 = vmax.f32 %v1343_v32, 0.0 }
 0x1d5   :  { %v365_v44 = vmax.f32 %v303_v39, 0.0  ;;  %v696_v45 = vmax.f32 %v634_v40, 0.0 }
 0x1d6   :  { %v1455_v38 = vmax.f32 %v1075_v36, %v1406_v37 }
 0x1d7   :  { %v745_v55 = vmax.f32 %v365_v44, %v696_v45 }
 0x1d8   :  { %v1504_v41 = vmax.f32 %v744_v35, %v1455_v38 }
 0x1d9   :  { %v1013_v42 = vpop.f32.mrf.mxu2  ;;  %v1344_v43 = vpop.f32.mrf.mxu3 }
 0x1da   :  { %1554 = vst.msk [vmem:[%s2813_s6 + $0x140] sm:$0xff] %vm1513_vm3, %v1504_v41  ;;  %v1014_v46 = vadd.f32 %v2438_v54, %v1013_v42  ;;  %v1345_v47 = vadd.f32 %v2438_v54, %v1344_v43  ;;  %v305_v48 = vpop.f32.mrf.mxu0  ;;  %v636_v49 = vpop.f32.mrf.mxu1 }
 0x1db   :  { %v306_v52 = vadd.f32 %v2438_v54, %v305_v48  ;;  %v637_v53 = vadd.f32 %v2438_v54, %v636_v49 }
 0x1dc   :  { %v1076_v51 = vmax.f32 %v1014_v46, 0.0  ;;  %v1407_v50 = vmax.f32 %v1345_v47, 0.0 }
 0x1dd   :  { %v366_v58 = vmax.f32 %v306_v52, 0.0  ;;  %v697_v59 = vmax.f32 %v637_v53, 0.0 }
 0x1de   :  { %v1456_v56 = vmax.f32 %v1076_v51, %v1407_v50 }
 0x1df   :  { %v746_v2 = vmax.f32 %v366_v58, %v697_v59 }
 0x1e0   :  { %v1505_v57 = vmax.f32 %v745_v55, %v1456_v56 }
 0x1e1   :  { %v1016_v60 = vpop.f32.mrf.mxu2  ;;  %v1347_v61 = vpop.f32.mrf.mxu3 }
 0x1e2   :  { %1555 = vst.msk [vmem:[%s2813_s6 + $0x148] sm:$0xff] %vm1513_vm3, %v1505_v57  ;;  %v1017_v62 = vadd.f32 %v2438_v54, %v1016_v60  ;;  %v1348_v63 = vadd.f32 %v2438_v54, %v1347_v61  ;;  %v307_v0 = vpop.f32.mrf.mxu0  ;;  %v638_v1 = vpop.f32.mrf.mxu1 }
 0x1e3   :  { %v308_v6 = vadd.f32 %v2438_v54, %v307_v0  ;;  %v639_v7 = vadd.f32 %v2438_v54, %v638_v1 }
 0x1e4   :  { %v1077_v3 = vmax.f32 %v1017_v62, 0.0  ;;  %v1408_v4 = vmax.f32 %v1348_v63, 0.0 }
 0x1e5   :  { %v367_v11 = vmax.f32 %v308_v6, 0.0  ;;  %v698_v12 = vmax.f32 %v639_v7, 0.0 }
 0x1e6   :  { %v1457_v5 = vmax.f32 %v1077_v3, %v1408_v4 }
 0x1e7   :  { %v747_v21 = vmax.f32 %v367_v11, %v698_v12  ;;  %v1670_v11 = vld [vmem:[%s2812_s5] ss:$0 sm:$0xff] }
 0x1e8   :  { %v1506_v8 = vmax.f32 %v746_v2, %v1457_v5 }
 0x1e9   :  { %v1018_v9 = vpop.f32.mrf.mxu2  ;;  %v1349_v10 = vpop.f32.mrf.mxu3 }
 0x1ea   :  { %1556 = vst.msk [vmem:[%s2813_s6 + $0x150] sm:$0xff] %vm1513_vm3, %v1506_v8  ;;  %v1019_v13 = vadd.f32 %v2438_v54, %v1018_v9  ;;  %v1350_v14 = vadd.f32 %v2438_v54, %v1349_v10  ;;  %v310_v15 = vpop.f32.mrf.mxu0  ;;  %v641_v16 = vpop.f32.mrf.mxu1 }
 0x1eb   :  { %v311_v19 = vadd.f32 %v2438_v54, %v310_v15  ;;  %v642_v20 = vadd.f32 %v2438_v54, %v641_v16 }
 0x1ec   :  { %v1078_v17 = vmax.f32 %v1019_v13, 0.0  ;;  %v1409_v18 = vmax.f32 %v1350_v14, 0.0 }
 0x1ed   :  { %v368_v24 = vmax.f32 %v311_v19, 0.0  ;;  %v699_v25 = vmax.f32 %v642_v20, 0.0 }
 0x1ee   :  { %v1458_v22 = vmax.f32 %v1078_v17, %v1409_v18 }
 0x1ef   :  { %v748_v32 = vmax.f32 %v368_v24, %v699_v25 }
 0x1f0   :  { %v1507_v23 = vmax.f32 %v747_v21, %v1458_v22 }
 0x1f1   :  { %v1021_v26 = vpop.f32.mrf.mxu2  ;;  %v1352_v27 = vpop.f32.mrf.mxu3 }
 0x1f2   :  { %1557 = vst.msk [vmem:[%s2813_s6 + $0x158] sm:$0xff] %vm1513_vm3, %v1507_v23  ;;  %v1022_v28 = vadd.f32 %v2438_v54, %v1021_v26  ;;  %v1353_v29 = vadd.f32 %v2438_v54, %v1352_v27  ;;  %v312_v30 = vpop.f32.mrf.mxu0  ;;  %v643_v31 = vpop.f32.mrf.mxu1 }
 0x1f3   :  { %v313_v36 = vadd.f32 %v2438_v54, %v312_v30  ;;  %v644_v37 = vadd.f32 %v2438_v54, %v643_v31 }
 0x1f4   :  { %v1079_v33 = vmax.f32 %v1022_v28, 0.0  ;;  %v1410_v34 = vmax.f32 %v1353_v29, 0.0 }
 0x1f5   :  { %v369_v41 = vmax.f32 %v313_v36, 0.0  ;;  %v700_v42 = vmax.f32 %v644_v37, 0.0 }
 0x1f6   :  { %v1459_v35 = vmax.f32 %v1079_v33, %v1410_v34 }
 0x1f7   :  { %v749_v50 = vmax.f32 %v369_v41, %v700_v42 }
 0x1f8   :  { %v1508_v38 = vmax.f32 %v748_v32, %v1459_v35 }
 0x1f9   :  { %v1023_v39 = vpop.f32.mrf.mxu2  ;;  %v1354_v40 = vpop.f32.mrf.mxu3 }
 0x1fa   :  { %1558 = vst.msk [vmem:[%s2813_s6 + $0x160] sm:$0xff] %vm1513_vm3, %v1508_v38  ;;  %v1024_v43 = vadd.f32 %v2438_v54, %v1023_v39  ;;  %v1355_v44 = vadd.f32 %v2438_v54, %v1354_v40  ;;  %v315_v45 = vpop.f32.mrf.mxu0  ;;  %v646_v46 = vpop.f32.mrf.mxu1 }
 0x1fb   :  { %v316_v49 = vadd.f32 %v2438_v54, %v315_v45  ;;  %v647_v51 = vadd.f32 %v2438_v54, %v646_v46 }
 0x1fc   :  { %v1080_v47 = vmax.f32 %v1024_v43, 0.0  ;;  %v1411_v48 = vmax.f32 %v1355_v44, 0.0 }
 0x1fd   :  { %v370_v55 = vmax.f32 %v316_v49, 0.0  ;;  %v701_v56 = vmax.f32 %v647_v51, 0.0 }
 0x1fe   :  { %v1460_v52 = vmax.f32 %v1080_v47, %v1411_v48 }
 0x1ff   :  { %v750_v63 = vmax.f32 %v370_v55, %v701_v56 }
 0x200   :  { %v1509_v53 = vmax.f32 %v749_v50, %v1460_v52 }
 0x201   :  { %v1026_v57 = vpop.f32.mrf.mxu2  ;;  %v1357_v58 = vpop.f32.mrf.mxu3 }
 0x202   :  { %1559 = vst.msk [vmem:[%s2813_s6 + $0x168] sm:$0xff] %vm1513_vm3, %v1509_v53  ;;  %v1027_v59 = vadd.f32 %v2438_v54, %v1026_v57  ;;  %v1358_v60 = vadd.f32 %v2438_v54, %v1357_v58  ;;  %v317_v61 = vpop.f32.mrf.mxu0  ;;  %v648_v62 = vpop.f32.mrf.mxu1 }
 0x203   :  { %v318_v3 = vadd.f32 %v2438_v54, %v317_v61  ;;  %v649_v4 = vadd.f32 %v2438_v54, %v648_v62 }
 0x204   :  { %v1081_v0 = vmax.f32 %v1027_v59, 0.0  ;;  %v1412_v1 = vmax.f32 %v1358_v60, 0.0 }
 0x205   :  { %v371_v8 = vmax.f32 %v318_v3, 0.0  ;;  %v702_v9 = vmax.f32 %v649_v4, 0.0 }
 0x206   :  { %v1461_v2 = vmax.f32 %v1081_v0, %v1412_v1 }
 0x207   :  { %v751_v19 = vmax.f32 %v371_v8, %v702_v9 }
 0x208   :  { %v1510_v5 = vmax.f32 %v750_v63, %v1461_v2 }
 0x209   :  { %v1028_v6 = vpop.f32.mrf.mxu2  ;;  %v1359_v7 = vpop.f32.mrf.mxu3 }
 0x20a   :  { %1560 = vst.msk [vmem:[%s2813_s6 + $0x170] sm:$0xff] %vm1513_vm3, %v1510_v5  ;;  %v1029_v10 = vadd.f32 %v2438_v54, %v1028_v6  ;;  %v1360_v12 = vadd.f32 %v1670_v11, %v1359_v7  ;;  %v320_v13 = vpop.f32.mrf.mxu0  ;;  %v651_v14 = vpop.f32.mrf.mxu1 }
 0x20b   :  { %v321_v17 = vadd.f32 %v1670_v11, %v320_v13  ;;  %v652_v18 = vadd.f32 %v1670_v11, %v651_v14 }
 0x20c   :  { %v1082_v15 = vmax.f32 %v1029_v10, 0.0  ;;  %v1413_v16 = vmax.f32 %v1360_v12, 0.0 }
 0x20d   :  { %v372_v22 = vmax.f32 %v321_v17, 0.0  ;;  %v703_v23 = vmax.f32 %v652_v18, 0.0 }
 0x20e   :  { %v1462_v20 = vmax.f32 %v1082_v15, %v1413_v16 }
 0x20f   :  { %v752_v29 = vmax.f32 %v372_v22, %v703_v23 }
 0x210   :  { %v1511_v21 = vmax.f32 %v751_v19, %v1462_v20 }
 0x211   :  { %v1031_v24 = vpop.f32.mrf.mxu2  ;;  %v1362_v25 = vpop.f32.mrf.mxu3 }
 0x212   :  { %1561 = vst.msk [vmem:[%s2813_s6 + $0x178] sm:$0xff] %vm1513_vm3, %v1511_v21  ;;  %v1032_v54 = vadd.f32 %v1670_v11, %v1031_v24  ;;  %v1363_v26 = vadd.f32 %v1670_v11, %v1362_v25  ;;  %v322_v27 = vpop.f32.mrf.mxu0  ;;  %v653_v28 = vpop.f32.mrf.mxu1 }
 0x214   :  { %v1083_v30 = vmax.f32 %v1032_v54, 0.0  ;;  %v1414_v31 = vmax.f32 %v1363_v26, 0.0 }
 0x216   :  { %v1463_v32 = vmax.f32 %v1083_v30, %v1414_v31 }
 0x218   :  { %v1512_v33 = vmax.f32 %v752_v29, %v1463_v32 }
 0x219   :  { %v1033_v34 = vpop.f32.mrf.mxu2  ;;  %v1364_v35 = vpop.f32.mrf.mxu3 }
 0x21a   :  { %1562 = vst.msk [vmem:[%s2813_s6 + $0x180] sm:$0xff] %vm1513_vm3, %v1512_v33 }

// kernel: dnn_v1_forward.5
= control target key start
LH: loop header
LB: loop body
LE: loop exit
PB: predicated region body
PF: predicated region fallthrough
CT: control target
= control target key end

     0   :  { %s393_s0 = inlined_call_operand.vmem [shape: f32[2,400], index: 0, kind: input, shape index: {}]   ;;  %s394_s1 = inlined_call_operand.vmem [shape: f32[400,10], index: 1, kind: input, shape index: {}]   ;;  %s395_s2 = inlined_call_operand.vmem [shape: f32[1,10], index: 2, kind: input, shape index: {}]   ;;  %s396_s3 = inlined_call_operand.hbm [shape: f32[2,10], index: 3, kind: output, shape index: {}]  }
   0x1   :  { %v45_v0 = vld [vmem:[%s394_s1 + $0x70] sm:$0xff]  ;;  %v46_v1 = vld [vmem:[%s394_s1 + $0x78] sm:$0xff]  ;;  %v43_v9 = vld [vmem:[%s394_s1 + $0x60] sm:$0xff] }
   0x2   :  { %v61_v2 = vld [vmem:[%s394_s1 + $0xf0] sm:$0xff]  ;;  %v88_v3 = vpack.c.bf16 %v46_v1, %v45_v0  ;;  %v62_v4 = vld [vmem:[%s394_s1 + $0xf8] sm:$0xff]  ;;  %v44_v10 = vld [vmem:[%s394_s1 + $0x68] sm:$0xff] }
   0x3   :  { %v77_v5 = vld [vmem:[%s394_s1 + $0x170] sm:$0xff]  ;;  %v78_v6 = vld [vmem:[%s394_s1 + $0x178] sm:$0xff]  ;;  %v96_v7 = vpack.c.bf16 %v62_v4, %v61_v2  ;;  %v59_v11 = vld [vmem:[%s394_s1 + $0xe0] sm:$0xff]  ;;  %v87_v12 = vpack.c.bf16 %v44_v10, %v43_v9 }
   0x4   :  { %v104_v8 = vpack.c.bf16 %v78_v6, %v77_v5  ;;  %114 = vmatpush.bf16.msra.mxu0 %v88_v3  ;;  %v60_v13 = vld [vmem:[%s394_s1 + $0xe8] sm:$0xff]  ;;  %v75_v14 = vld [vmem:[%s394_s1 + $0x160] sm:$0xff]  ;;  %v41_v18 = vld [vmem:[%s394_s1 + $0x50] sm:$0xff] }
   0x5   :  { %v76_v15 = vld [vmem:[%s394_s1 + $0x168] sm:$0xff]  ;;  %127 = vmatpush.bf16.msra.mxu1 %v96_v7  ;;  %v95_v16 = vpack.c.bf16 %v60_v13, %v59_v11  ;;  %v42_v19 = vld [vmem:[%s394_s1 + $0x58] sm:$0xff]  ;;  %v57_v20 = vld [vmem:[%s394_s1 + $0xd0] sm:$0xff] }
   0x6   :  { %140 = vmatpush.bf16.msra.mxu2 %v104_v8  ;;  %v103_v17 = vpack.c.bf16 %v76_v15, %v75_v14  ;;  %v58_v21 = vld [vmem:[%s394_s1 + $0xd8] sm:$0xff]  ;;  %v73_v22 = vld [vmem:[%s394_s1 + $0x150] sm:$0xff]  ;;  %v86_v24 = vpack.c.bf16 %v42_v19, %v41_v18  ;;  %v39_v27 = vld [vmem:[%s394_s1 + $0x40] sm:$0xff] }
   0x7   :  { %v74_v23 = vld [vmem:[%s394_s1 + $0x158] sm:$0xff]  ;;  %v94_v25 = vpack.c.bf16 %v58_v21, %v57_v20  ;;  %v40_v28 = vld [vmem:[%s394_s1 + $0x48] sm:$0xff]  ;;  %v55_v29 = vld [vmem:[%s394_s1 + $0xc0] sm:$0xff] }
   0x8   :  { %115 = vmatpush.bf16.msra.mxu0 %v87_v12  ;;  %v102_v26 = vpack.c.bf16 %v74_v23, %v73_v22  ;;  %v56_v30 = vld [vmem:[%s394_s1 + $0xc8] sm:$0xff]  ;;  %v71_v31 = vld [vmem:[%s394_s1 + $0x140] sm:$0xff]  ;;  %v85_v33 = vpack.c.bf16 %v40_v28, %v39_v27  ;;  %v37_v34 = vld [vmem:[%s394_s1 + $0x30] sm:$0xff] }
   0x9   :  { %128 = vmatpush.bf16.msra.mxu1 %v95_v16  ;;  %v72_v32 = vld [vmem:[%s394_s1 + $0x148] sm:$0xff]  ;;  %v38_v35 = vld [vmem:[%s394_s1 + $0x38] sm:$0xff]  ;;  %v53_v36 = vld [vmem:[%s394_s1 + $0xb0] sm:$0xff]  ;;  %v93_v37 = vpack.c.bf16 %v56_v30, %v55_v29 }
   0xa   :  { %141 = vmatpush.bf16.msra.mxu2 %v103_v17  ;;  %v101_v38 = vpack.c.bf16 %v72_v32, %v71_v31  ;;  %v79_v39 = vld [vmem:[%s394_s1 + $0x180] sm:$0xff]  ;;  %v80_v40 = vld [vmem:[%s394_s1 + $0x188] sm:$0xff]  ;;  %v54_v42 = vld [vmem:[%s394_s1 + $0xb8] sm:$0xff]  ;;  %v84_v46 = vpack.c.bf16 %v38_v35, %v37_v34 }
   0xb   :  { %v16_v41 = vld [vmem:[%s393_s0] sm:$0xff]  ;;  %v69_v43 = vld [vmem:[%s394_s1 + $0x130] sm:$0xff]  ;;  %v70_v44 = vld [vmem:[%s394_s1 + $0x138] sm:$0xff]  ;;  %v105_v45 = vpack.c.bf16 %v80_v40, %v79_v39  ;;  %v92_v49 = vpack.c.bf16 %v54_v42, %v53_v36 }
   0xc   :  { %116 = vmatpush.bf16.msra.mxu0 %v86_v24  ;;  %18 = vst [vmem:[#allocation1] ss:$4 sm:$0xff] %v16_v41  ;;  %v35_v47 = vld [vmem:[%s394_s1 + $0x20] sm:$0xff]  ;;  %v36_v48 = vld [vmem:[%s394_s1 + $0x28] sm:$0xff]  ;;  %v100_v50 = vpack.c.bf16 %v70_v44, %v69_v43 }
   0xd   :  { %129 = vmatpush.bf16.msra.mxu1 %v94_v25  ;;  %160 = vmatpush.bf16.msra.mxu3 %v105_v45  ;;  %v51_v51 = vld [vmem:[%s394_s1 + $0xa0] sm:$0xff]  ;;  %v52_v52 = vld [vmem:[%s394_s1 + $0xa8] sm:$0xff] }
   0xe   :  { %142 = vmatpush.bf16.msra.mxu2 %v102_v26  ;;  %v67_v53 = vld [vmem:[%s394_s1 + $0x120] sm:$0xff]  ;;  %v68_v54 = vld [vmem:[%s394_s1 + $0x128] sm:$0xff] }
  0x10   :  { %117 = vmatpush.bf16.msra.mxu0 %v85_v33 }
  0x11   :  { %130 = vmatpush.bf16.msra.mxu1 %v93_v37 }
  0x12   :  { %143 = vmatpush.bf16.msra.mxu2 %v101_v38 }
  0x13   :  { %8 = vsyncpa [#allocation3], 0  ;;  %v83_v55 = vpack.c.bf16 %v36_v48, %v35_v47  ;;  %v33_v56 = vld [vmem:[%s394_s1 + $0x10] sm:$0xff]  ;;  %v91_v57 = vpack.c.bf16 %v52_v52, %v51_v51  ;;  %v99_v58 = vpack.c.bf16 %v68_v54, %v67_v53  ;;  %v22_v59 = vld.sshfl [vmem:[#allocation1 + $0x18] sm:$0xff pattern:$0x73625140] }
  0x14   :  { %118 = vmatpush.bf16.msra.mxu0 %v84_v46  ;;  %vm110_vm0 = vcmask 130048   ;;  %v34_v60 = vld [vmem:[%s394_s1 + $0x18] sm:$0xff]  ;;  %v49_v61 = vld [vmem:[%s394_s1 + $0x90] sm:$0xff]  ;;  %v30_v62 = vpack.c.bf16 %v22_v59, %v22_v59  ;;  %v31_v5 = vld [vmem:[%s394_s1] sm:$0xff]  ;;  %s213_s5 = smov [#allocation2]   ;;  %s175_s9 = sshll.u32 %s396_s3, 4  ;;  %s176_s9 = int_to_ptr.hbm [resolvable:$true] %s175_s9 }
  0x15   :  { %131 = vmatpush.bf16.msra.mxu1 %v92_v49  ;;  %v50_v63 = vld [vmem:[%s394_s1 + $0x98] sm:$0xff]  ;;  %v65_v0 = vld [vmem:[%s394_s1 + $0x110] sm:$0xff]  ;;  %v82_v2 = vpack.c.bf16 %v34_v60, %v33_v56  ;;  %v32_v6 = vld [vmem:[%s394_s1 + $0x8] sm:$0xff]  ;;  %s173_s6 = sshll.u32 %s213_s5, 4  ;;  %vm166_vm1 = vcmask 74752   ;;  %s174_s6 = int_to_ptr.vmem [resolvable:$true] %s173_s6 }
  0x16   :  { %144 = vmatpush.bf16.msra.mxu2 %v100_v50  ;;  %v66_v1 = vld [vmem:[%s394_s1 + $0x118] sm:$0xff]  ;;  %184 = vmatmul.msk.bf16.vlgmr.msra.gmra.mxu3 %vm110_vm0, %v30_v62  ;;  %v90_v3 = vpack.c.bf16 %v50_v63, %v49_v61  ;;  %v47_v7 = vld [vmem:[%s394_s1 + $0x80] sm:$0xff]  ;;  %v48_v8 = vld [vmem:[%s394_s1 + $0x88] sm:$0xff]  ;;  %v81_v11 = vpack.c.bf16 %v32_v6, %v31_v5 }
  0x17   :  { %v98_v4 = vpack.c.bf16 %v66_v1, %v65_v0  ;;  %v63_v9 = vld [vmem:[%s394_s1 + $0x100] sm:$0xff]  ;;  %v64_v10 = vld [vmem:[%s394_s1 + $0x108] sm:$0xff]  ;;  %v89_v13 = vpack.c.bf16 %v48_v8, %v47_v7  ;;  %v21_v16 = vld.sshfl [vmem:[#allocation1 + $0x10] sm:$0xff pattern:$0x73625140] }
  0x18   :  { %119 = vmatpush.bf16.msra.mxu0 %v83_v55  ;;  %v19_v12 = vld.sshfl [vmem:[#allocation1] sm:$0xff pattern:$0x73625140]  ;;  %v97_v14 = vpack.c.bf16 %v64_v10, %v63_v9  ;;  %v20_v15 = vld.sshfl [vmem:[#allocation1 + $0x8] sm:$0xff pattern:$0x73625140]  ;;  %v29_v19 = vpack.c.bf16 %v21_v16, %v21_v16 }
  0x19   :  { %132 = vmatpush.bf16.msra.mxu1 %v91_v57  ;;  %v27_v17 = vpack.c.bf16 %v19_v12, %v19_v12  ;;  %v28_v18 = vpack.c.bf16 %v20_v15, %v20_v15  ;;  %v186_v21 = vld [vmem:[%s395_s2] ss:$0 sm:$0xff] }
  0x1a   :  { %145 = vmatpush.bf16.msra.mxu2 %v99_v58 }
  0x1c   :  { %120 = vmatpush.bf16.msra.mxu0 %v82_v2 }
  0x1d   :  { %133 = vmatpush.bf16.msra.mxu1 %v90_v3 }
  0x1e   :  { %146 = vmatpush.bf16.msra.mxu2 %v98_v4 }
  0x20   :  { %121 = vmatpush.bf16.msra.mxu0 %v81_v11 }
  0x21   :  { %134 = vmatpush.bf16.msra.mxu1 %v89_v13 }
  0x22   :  { %147 = vmatpush.bf16.msra.mxu2 %v97_v14 }
  0x23   :  { %122 = vmatmul.bf16.vlgmr.msra.gmra.mxu0 %v27_v17 }
  0x24   :  { %135 = vmatmul.bf16.vlgmr.msra.gmra.mxu1 %v28_v18 }
  0x25   :  { %148 = vmatmul.bf16.vlgmr.msra.gmra.mxu2 %v29_v19 }
  0x99   :  { %v162_v20 = vpop.f32.mrf.mxu3 }
  0xa0   :  { %v123_v22 = vpop.f32.mrf.mxu0 }
  0xa1   :  { %v124_v23 = vadd.f32 %v186_v21, %v123_v22  ;;  %v136_v24 = vpop.f32.mrf.mxu1  ;;  %v164_v25 = vpop.f32.mrf.mxu3 }
  0xa3   :  { %v137_v26 = vadd.f32 %v136_v24, %v124_v23 }
  0xa8   :  { %v149_v27 = vpop.f32.mrf.mxu2  ;;  %v125_v29 = vpop.f32.mrf.mxu0 }
  0xa9   :  { %v150_v28 = vadd.f32 %v149_v27, %v137_v26  ;;  %v138_v30 = vpop.f32.mrf.mxu1 }
  0xab   :  { %v163_v31 = vadd.f32 %v162_v20, %v150_v28 }
  0xad   :  { %167 = vst.msk [vmem:[#allocation2] sm:$0x3] %vm166_vm1, %v163_v31 }
  0xae   :  { %178 = dma.vmem_to_hbm [thread:$0]  %s174_s6, 32, %s176_s9, [#allocation3]  }
  0xb0   :  { %v151_v32 = vpop.f32.mrf.mxu2 }
  0xb1   :  { %211 = dma.done.wait [#allocation3], 32  }
  0xb2   :  { %212 = vsyncadd [#allocation3], 4294967264 }
  0xb3   :  { %183 = vsyncpa [#allocation3], 1 }

// kernel: dnn_v1_forward.4
= control target key start
LH: loop header
LB: loop body
LE: loop exit
PB: predicated region body
PF: predicated region fallthrough
CT: control target
= control target key end

     0   :  { %vm92_vm0 = vcmask 1042432   ;;  %vm79_vm1 = vcmask 179200   ;;  %vm471_vm2 = vcmask 130048   ;;  %vm478_vm3 = vcmask 123904   ;;  %s900_s4 = inlined_call_operand.vmem [shape: f32[150,16], index: 4, kind: input, shape index: {}]   ;;  %s901_s1 = inlined_call_operand.vmem [shape: f32[50,150], index: 1, kind: input, shape index: {}]   ;;  %s902_s0 = inlined_call_operand.vmem [shape: f32[50,150], index: 0, kind: input, shape index: {}]   ;;  %s903_s5 = inlined_call_operand.vmem [shape: f32[1,16], index: 5, kind: input, shape index: {}]   ;;  %s904_s2 = inlined_call_operand.vmem [shape: f32[50,150], index: 2, kind: input, shape index: {}]   ;;  %s905_s3 = inlined_call_operand.vmem [shape: f32[50,150], index: 3, kind: input, shape index: {}]   ;;  %s906_s6 = inlined_call_operand.vmem [shape: f32[50,16], index: 6, kind: output, shape index: {}]  }
   0x1   :  { %v38_v0 = vld [vmem:[%s900_s4 + $0x70] sm:$0xff]  ;;  %v39_v1 = vld [vmem:[%s900_s4 + $0x78] sm:$0xff]  ;;  %v36_v2 = vld [vmem:[%s900_s4 + $0x60] sm:$0xff] }
   0x2   :  { %v545_v3 = vpack.c.bf16 %v39_v1, %v38_v0  ;;  %v37_v4 = vld [vmem:[%s900_s4 + $0x68] sm:$0xff]  ;;  %v42_v6 = vld [vmem:[%s900_s4 + $0x90] sm:$0x3f]  ;;  %v35_v8 = vld [vmem:[%s900_s4 + $0x58] sm:$0xff] }
   0x3   :  { %v552_v5 = vpack.c.bf16 %v37_v4, %v36_v2  ;;  %v34_v7 = vld [vmem:[%s900_s4 + $0x50] sm:$0xff]  ;;  %v52_v9 = vpack.c.bf16 %v42_v6, %v42_v6  ;;  %v40_v10 = vld [vmem:[%s900_s4 + $0x80] sm:$0xff]  ;;  %v41_v11 = vld [vmem:[%s900_s4 + $0x88] sm:$0xff] }
   0x4   :  { %96 = vmatpush.bf16.msra.mxu0 %v545_v3  ;;  %193 = vmatpush.bf16.msra.mxu2 %v545_v3  ;;  %v573_v13 = vpack.c.bf16 %v35_v8, %v34_v7  ;;  %v32_v14 = vld [vmem:[%s900_s4 + $0x40] sm:$0xff]  ;;  %v33_v15 = vld [vmem:[%s900_s4 + $0x48] sm:$0xff]  ;;  %v583_v16 = vpack.c.bf16 %v41_v11, %v40_v10  ;;  %v162_v18 = vld [vmem:[%s901_s1 + $0x18] sm:$0xff] }
   0x5   :  { %v569_v12 = vsel %vm92_vm0, %v52_v9, 0  ;;  %v160_v17 = vld [vmem:[%s901_s1 + $0x8] sm:$0xff]  ;;  %v57_v20 = vld [vmem:[%s902_s0 + $0x18] sm:$0xff]  ;;  %v599_v21 = vpack.c.bf16 %v33_v15, %v32_v14  ;;  %v30_v22 = vld [vmem:[%s900_s4 + $0x30] sm:$0xff] }
   0x6   :  { %227 = vmatpush.bf16.msra.mxu3 %v569_v12  ;;  %130 = vmatpush.bf16.msra.mxu1 %v569_v12  ;;  %v55_v19 = vld [vmem:[%s902_s0 + $0x8] sm:$0xff]  ;;  %v31_v23 = vld [vmem:[%s900_s4 + $0x38] sm:$0xff]  ;;  %v174_v24 = vpack.c.bf16 %v162_v18, %v160_v17  ;;  %v28_v27 = vld [vmem:[%s900_s4 + $0x20] sm:$0xff] }
   0x7   :  { %v69_v25 = vpack.c.bf16 %v57_v20, %v55_v19  ;;  %v613_v26 = vpack.c.bf16 %v31_v23, %v30_v22  ;;  %v29_v28 = vld [vmem:[%s900_s4 + $0x28] sm:$0xff]  ;;  %v26_v30 = vld [vmem:[%s900_s4 + $0x10] sm:$0xff]  ;;  %v27_v31 = vld [vmem:[%s900_s4 + $0x18] sm:$0xff] }
   0x8   :  { %97 = vmatpush.bf16.msra.mxu0 %v552_v5  ;;  %194 = vmatpush.bf16.msra.mxu2 %v552_v5  ;;  %v45_v29 = vpack.c.bf16 %v29_v28, %v28_v27  ;;  %v44_v32 = vpack.c.bf16 %v27_v31, %v26_v30  ;;  %v24_v33 = vld [vmem:[%s900_s4] sm:$0xff]  ;;  %v25_v34 = vld [vmem:[%s900_s4 + $0x8] sm:$0xff]  ;;  %v166_v37 = vld [vmem:[%s901_s1 + $0x38] sm:$0xff] }
   0x9   :  { %v54_v35 = vld [vmem:[%s902_s0] sm:$0xff]  ;;  %v164_v36 = vld [vmem:[%s901_s1 + $0x28] sm:$0xff]  ;;  %v61_v39 = vld [vmem:[%s902_s0 + $0x38] sm:$0xff]  ;;  %v43_v40 = vpack.c.bf16 %v25_v34, %v24_v33 }
   0xa   :  { %228 = vmatpush.bf16.msra.mxu3 %v583_v16  ;;  %131 = vmatpush.bf16.msra.mxu1 %v583_v16  ;;  %v59_v38 = vld [vmem:[%s902_s0 + $0x28] sm:$0xff]  ;;  %v56_v41 = vld [vmem:[%s902_s0 + $0x10] sm:$0xff]  ;;  %v159_v42 = vld [vmem:[%s901_s1] sm:$0xff]  ;;  %v176_v44 = vpack.c.bf16 %v166_v37, %v164_v36 }
   0xb   :  { %v161_v43 = vld [vmem:[%s901_s1 + $0x10] sm:$0xff]  ;;  %v71_v45 = vpack.c.bf16 %v61_v39, %v59_v38  ;;  %v68_v46 = vpack.c.bf16 %v56_v41, %v54_v35  ;;  %v58_v48 = vld [vmem:[%s902_s0 + $0x20] sm:$0xff]  ;;  %v168_v49 = vld [vmem:[%s901_s1 + $0x48] sm:$0xff] }
   0xc   :  { %98 = vmatpush.bf16.msra.mxu0 %v573_v13  ;;  %195 = vmatpush.bf16.msra.mxu2 %v573_v13  ;;  %v173_v47 = vpack.c.bf16 %v161_v43, %v159_v42  ;;  %v170_v50 = vld [vmem:[%s901_s1 + $0x58] sm:$0xff]  ;;  %v63_v51 = vld [vmem:[%s902_s0 + $0x48] sm:$0xff]  ;;  %v60_v53 = vld [vmem:[%s902_s0 + $0x30] sm:$0xff] }
   0xd   :  { %488 = vmatmul.msk.bf16.vlgmr.msra.gmra.mxu3 %vm79_vm1, %v174_v24  ;;  %484 = vmatmul.msk.bf16.vlgmr.msra.gmra.mxu1 %vm79_vm1, %v69_v25  ;;  %v65_v52 = vld [vmem:[%s902_s0 + $0x58] sm:$0xff]  ;;  %v163_v54 = vld [vmem:[%s901_s1 + $0x20] sm:$0xff]  ;;  %v165_v55 = vld [vmem:[%s901_s1 + $0x30] sm:$0xff]  ;;  %v178_v56 = vpack.c.bf16 %v170_v50, %v168_v49  ;;  %v70_v58 = vpack.c.bf16 %v60_v53, %v58_v48 }
   0xe   :  { %331 = vmatpush.bf16.msrb.mxu3 %v569_v12  ;;  %297 = vmatpush.bf16.msrb.mxu1 %v545_v3  ;;  %v73_v57 = vpack.c.bf16 %v65_v52, %v63_v51  ;;  %v175_v59 = vpack.c.bf16 %v165_v55, %v163_v54  ;;  %v62_v60 = vld [vmem:[%s902_s0 + $0x40] sm:$0xff]  ;;  %v172_v61 = vld [vmem:[%s901_s1 + $0x68] sm:$0x3]  ;;  %v64_v63 = vld [vmem:[%s902_s0 + $0x50] sm:$0xff] }
   0xf   :  { %v67_v62 = vld [vmem:[%s902_s0 + $0x68] sm:$0x3]  ;;  %v167_v0 = vld [vmem:[%s901_s1 + $0x40] sm:$0xff]  ;;  %v169_v1 = vld [vmem:[%s901_s1 + $0x50] sm:$0xff]  ;;  %v180_v2 = vpack.c.bf16 %v172_v61, %v172_v61  ;;  %v72_v4 = vpack.c.bf16 %v64_v63, %v62_v60 }
  0x10   :  { %99 = vmatpush.bf16.msra.mxu0 %v599_v21  ;;  %196 = vmatpush.bf16.msra.mxu2 %v599_v21  ;;  %v264_v6 = vld [vmem:[%s904_s2 + $0x8] sm:$0xff]  ;;  %v266_v7 = vld [vmem:[%s904_s2 + $0x18] sm:$0xff]  ;;  %v263_v8 = vld [vmem:[%s904_s2] sm:$0xff] }
  0x11   :  { %v265_v9 = vld [vmem:[%s904_s2 + $0x10] sm:$0xff]  ;;  %v66_v10 = vld [vmem:[%s902_s0 + $0x60] sm:$0x3]  ;;  %v268_v17 = vld [vmem:[%s904_s2 + $0x28] sm:$0xff] }
  0x12   :  { %298 = vmatpush.bf16.msrb.mxu1 %v552_v5  ;;  %332 = vmatpush.bf16.msrb.mxu3 %v583_v16  ;;  %v171_v11 = vld [vmem:[%s901_s1 + $0x60] sm:$0x3]  ;;  %v74_v14 = vpack.c.bf16 %v66_v10, %v66_v10  ;;  %v270_v18 = vld [vmem:[%s904_s2 + $0x38] sm:$0xff]  ;;  %v269_v20 = vld [vmem:[%s904_s2 + $0x30] sm:$0xff] }
  0x13   :  { %v179_v15 = vpack.c.bf16 %v171_v11, %v171_v11  ;;  %v267_v19 = vld [vmem:[%s904_s2 + $0x20] sm:$0xff]  ;;  %v361_v22 = vld [vmem:[%s905_s3 + $0x8] sm:$0xff]  ;;  %v363_v23 = vld [vmem:[%s905_s3 + $0x18] sm:$0xff]  ;;  %v280_v24 = vpack.c.bf16 %v270_v18, %v268_v17 }
  0x14   :  { %100 = vmatpush.bf16.msra.mxu0 %v613_v26  ;;  %197 = vmatpush.bf16.msra.mxu2 %v613_v26  ;;  %v279_v25 = vpack.c.bf16 %v269_v20, %v267_v19  ;;  %v375_v27 = vpack.c.bf16 %v363_v23, %v361_v22  ;;  %v364_v28 = vld [vmem:[%s905_s3 + $0x20] sm:$0xff]  ;;  %v274_v30 = vld [vmem:[%s904_s2 + $0x58] sm:$0xff]  ;;  %v366_v33 = vld [vmem:[%s905_s3 + $0x30] sm:$0xff] }
  0x15   :  { %v271_v31 = vld [vmem:[%s904_s2 + $0x40] sm:$0xff]  ;;  %v365_v34 = vld [vmem:[%s905_s3 + $0x28] sm:$0xff]  ;;  %v367_v35 = vld [vmem:[%s905_s3 + $0x38] sm:$0xff]  ;;  %v376_v38 = vpack.c.bf16 %v366_v33, %v364_v28 }
  0x16   :  { %299 = vmatpush.bf16.msrb.mxu1 %v573_v13  ;;  %v377_v39 = vpack.c.bf16 %v367_v35, %v365_v34  ;;  %v276_v41 = vld [vmem:[%s904_s2 + $0x68] sm:$0x3]  ;;  %v275_v42 = vld [vmem:[%s904_s2 + $0x60] sm:$0x3]  ;;  %v370_v43 = vld [vmem:[%s905_s3 + $0x50] sm:$0xff] }
  0x17   :  { %v372_v50 = vld [vmem:[%s905_s3 + $0x60] sm:$0x3]  ;;  %v373_v51 = vld [vmem:[%s905_s3 + $0x68] sm:$0x3] }
  0x18   :  { %101 = vmatpush.bf16.msra.mxu0 %v45_v29  ;;  %198 = vmatpush.bf16.msra.mxu2 %v45_v29  ;;  %v380_v53 = vpack.c.bf16 %v372_v50, %v372_v50  ;;  %v381_v54 = vpack.c.bf16 %v373_v51, %v373_v51 }
  0x1a   :  { %300 = vmatpush.bf16.msrb.mxu1 %v599_v21 }
  0x1c   :  { %102 = vmatpush.bf16.msra.mxu0 %v44_v32  ;;  %199 = vmatpush.bf16.msra.mxu2 %v44_v32 }
  0x1d   :  { %489 = vmatmul.msk.bf16.gmra.mxu3 %vm79_vm1, %v176_v44  ;;  %485 = vmatmul.msk.bf16.gmra.mxu1 %vm79_vm1, %v71_v45  ;;  %v369_v44 = vld [vmem:[%s905_s3 + $0x48] sm:$0xff]  ;;  %v371_v45 = vld [vmem:[%s905_s3 + $0x58] sm:$0xff] }
  0x1e   :  { %301 = vmatpush.bf16.msrb.mxu1 %v613_v26  ;;  %v379_v49 = vpack.c.bf16 %v371_v45, %v369_v44 }
  0x20   :  { %103 = vmatpush.bf16.msra.mxu0 %v43_v40  ;;  %200 = vmatpush.bf16.msra.mxu2 %v43_v40 }
  0x22   :  { %302 = vmatpush.bf16.msrb.mxu1 %v45_v29 }
  0x23   :  { %104 = vmatmul.bf16.vlgmr.msra.gmra.mxu0 %v68_v46  ;;  %201 = vmatmul.bf16.vlgmr.msra.gmra.mxu2 %v173_v47  ;;  %v284_v46 = vpack.c.bf16 %v276_v41, %v276_v41  ;;  %v283_v47 = vpack.c.bf16 %v275_v42, %v275_v42 }
  0x24   :  { %428 = vmatpush.bf16.msrb.mxu2 %v569_v12  ;;  %394 = vmatpush.bf16.msrb.mxu0 %v545_v3  ;;  %v75_v3 = vpack.c.bf16 %v67_v62, %v67_v62  ;;  %v278_v12 = vpack.c.bf16 %v266_v7, %v264_v6 }
  0x26   :  { %303 = vmatpush.bf16.msrb.mxu1 %v44_v32 }
  0x28   :  { %395 = vmatpush.bf16.msrb.mxu0 %v552_v5  ;;  %429 = vmatpush.bf16.msrb.mxu2 %v583_v16  ;;  %v177_v5 = vpack.c.bf16 %v169_v1, %v167_v0  ;;  %v360_v16 = vld [vmem:[%s905_s3] sm:$0xff] }
  0x2a   :  { %304 = vmatpush.bf16.msrb.mxu1 %v43_v40 }
  0x2c   :  { %396 = vmatpush.bf16.msrb.mxu0 %v573_v13  ;;  %v277_v13 = vpack.c.bf16 %v265_v9, %v263_v8 }
  0x2d   :  { %490 = vmatmul.msk.bf16.gmra.mxu3 %vm79_vm1, %v178_v56  ;;  %486 = vmatmul.msk.bf16.gmra.mxu1 %vm79_vm1, %v73_v57 }
  0x30   :  { %397 = vmatpush.bf16.msrb.mxu0 %v599_v21  ;;  %v362_v21 = vld [vmem:[%s905_s3 + $0x10] sm:$0xff] }
  0x33   :  { %109 = vmatmul.bf16.gmra.mxu0 %v70_v58  ;;  %206 = vmatmul.bf16.gmra.mxu2 %v175_v59  ;;  %v822_v58 = vld [vmem:[%s903_s5] ss:$0 sm:$0xff] }
  0x34   :  { %398 = vmatpush.bf16.msrb.mxu0 %v613_v26  ;;  %v374_v26 = vpack.c.bf16 %v362_v21, %v360_v16 }
  0x38   :  { %399 = vmatpush.bf16.msrb.mxu0 %v45_v29  ;;  %v272_v29 = vld [vmem:[%s904_s2 + $0x48] sm:$0xff] }
  0x39   :  { %v282_v36 = vpack.c.bf16 %v274_v30, %v272_v29 }
  0x3c   :  { %400 = vmatpush.bf16.msrb.mxu0 %v44_v32  ;;  %v273_v32 = vld [vmem:[%s904_s2 + $0x50] sm:$0xff] }
  0x3d   :  { %491 = vmatmul.msk.bf16.gmra.mxu3 %vm79_vm1, %v180_v2  ;;  %487 = vmatmul.msk.bf16.gmra.mxu1 %vm79_vm1, %v75_v3  ;;  %v281_v37 = vpack.c.bf16 %v273_v32, %v271_v31 }
  0x40   :  { %401 = vmatpush.bf16.msrb.mxu0 %v43_v40  ;;  %v368_v40 = vld [vmem:[%s905_s3 + $0x40] sm:$0xff] }
  0x41   :  { %v378_v48 = vpack.c.bf16 %v370_v43, %v368_v40 }
  0x43   :  { %114 = vmatmul.bf16.gmra.mxu0 %v72_v4  ;;  %211 = vmatmul.bf16.gmra.mxu2 %v177_v5 }
  0x4d   :  { %492 = vmatmul.msk.bf16.vlgmr.msrb.gmra.mxu3 %vm79_vm1, %v278_v12  ;;  %305 = vmatmul.bf16.vlgmr.msrb.gmra.mxu1 %v277_v13 }
  0x53   :  { %119 = vmatmul.bf16.gmra.mxu0 %v74_v14  ;;  %216 = vmatmul.bf16.gmra.mxu2 %v179_v15 }
  0x5d   :  { %493 = vmatmul.msk.bf16.gmra.mxu3 %vm79_vm1, %v280_v24  ;;  %310 = vmatmul.bf16.gmra.mxu1 %v279_v25 }
  0x63   :  { %402 = vmatmul.bf16.vlgmr.msrb.gmra.mxu0 %v374_v26  ;;  %496 = vmatmul.msk.bf16.vlgmr.msrb.gmra.mxu2 %vm79_vm1, %v375_v27 }
  0x6d   :  { %494 = vmatmul.msk.bf16.gmra.mxu3 %vm79_vm1, %v282_v36  ;;  %315 = vmatmul.bf16.gmra.mxu1 %v281_v37 }
  0x73   :  { %407 = vmatmul.bf16.gmra.mxu0 %v376_v38  ;;  %497 = vmatmul.msk.bf16.gmra.mxu2 %vm79_vm1, %v377_v39 }
  0x7d   :  { %495 = vmatmul.msk.bf16.gmra.mxu3 %vm79_vm1, %v284_v46  ;;  %320 = vmatmul.bf16.gmra.mxu1 %v283_v47 }
  0x83   :  { %412 = vmatmul.bf16.gmra.mxu0 %v378_v48  ;;  %498 = vmatmul.msk.bf16.gmra.mxu2 %vm79_vm1, %v379_v49 }
  0x8a   :  { %v133_v52 = vpop.f32.mrf.mxu1 }
  0x90   :  { %v230_v55 = vpop.f32.mrf.mxu3 }
  0x92   :  { %v135_v56 = vpop.f32.mrf.mxu1 }
  0x93   :  { %417 = vmatmul.bf16.gmra.mxu0 %v380_v53  ;;  %499 = vmatmul.msk.bf16.gmra.mxu2 %vm79_vm1, %v381_v54 }
  0x98   :  { %v232_v57 = vpop.f32.mrf.mxu3 }
  0x9a   :  { %v138_v59 = vpop.f32.mrf.mxu1 }
  0xa0   :  { %v105_v60 = vpop.f32.mrf.mxu0  ;;  %v235_v63 = vpop.f32.mrf.mxu3 }
  0xa1   :  { %v106_v61 = vadd.f32 %v822_v58, %v105_v60 }
  0xa2   :  { %v140_v2 = vpop.f32.mrf.mxu1 }
  0xa3   :  { %v134_v62 = vadd.f32 %v133_v52, %v106_v61 }
  0xa5   :  { %v152_v6 = vmax.f32 %v134_v62, 0.0 }
  0xa6   :  { %v202_v0 = vpop.f32.mrf.mxu2 }
  0xa7   :  { %v203_v1 = vadd.f32 %v822_v58, %v202_v0 }
  0xa8   :  { %v107_v3 = vpop.f32.mrf.mxu0  ;;  %v237_v10 = vpop.f32.mrf.mxu3 }
  0xa9   :  { %v231_v4 = vadd.f32 %v230_v55, %v203_v1  ;;  %v108_v5 = vadd.f32 %v822_v58, %v107_v3 }
  0xaa   :  { %v143_v13 = vpop.f32.mrf.mxu1 }
  0xab   :  { %v249_v7 = vmax.f32 %v231_v4, 0.0  ;;  %v136_v8 = vadd.f32 %v135_v56, %v108_v5 }
  0xad   :  { %v827_v9 = vmax.f32 %v152_v6, %v249_v7  ;;  %v153_v17 = vmax.f32 %v136_v8, 0.0 }
  0xae   :  { %v204_v11 = vpop.f32.mrf.mxu2 }
  0xaf   :  { %v205_v12 = vadd.f32 %v822_v58, %v204_v11 }
  0xb0   :  { %v110_v14 = vpop.f32.mrf.mxu0  ;;  %v240_v21 = vpop.f32.mrf.mxu3 }
  0xb1   :  { %v233_v15 = vadd.f32 %v232_v57, %v205_v12  ;;  %v111_v16 = vadd.f32 %v822_v58, %v110_v14 }
  0xb2   :  { %v145_v24 = vpop.f32.mrf.mxu1 }
  0xb3   :  { %v250_v18 = vmax.f32 %v233_v15, 0.0  ;;  %v139_v19 = vadd.f32 %v138_v59, %v111_v16 }
  0xb5   :  { %v831_v20 = vmax.f32 %v153_v17, %v250_v18  ;;  %v154_v28 = vmax.f32 %v139_v19, 0.0 }
  0xb6   :  { %v207_v22 = vpop.f32.mrf.mxu2 }
  0xb7   :  { %v208_v23 = vadd.f32 %v822_v58, %v207_v22 }
  0xb8   :  { %v112_v25 = vpop.f32.mrf.mxu0  ;;  %v242_v32 = vpop.f32.mrf.mxu3 }
  0xb9   :  { %v236_v26 = vadd.f32 %v235_v63, %v208_v23  ;;  %v113_v27 = vadd.f32 %v822_v58, %v112_v25 }
  0xba   :  { %v148_v35 = vpop.f32.mrf.mxu1 }
  0xbb   :  { %v251_v29 = vmax.f32 %v236_v26, 0.0  ;;  %v141_v30 = vadd.f32 %v140_v2, %v113_v27 }
  0xbd   :  { %v835_v31 = vmax.f32 %v154_v28, %v251_v29  ;;  %v155_v39 = vmax.f32 %v141_v30, 0.0 }
  0xbe   :  { %v209_v33 = vpop.f32.mrf.mxu2 }
  0xbf   :  { %v210_v34 = vadd.f32 %v822_v58, %v209_v33 }
  0xc0   :  { %v115_v36 = vpop.f32.mrf.mxu0  ;;  %v245_v43 = vpop.f32.mrf.mxu3 }
  0xc1   :  { %v238_v37 = vadd.f32 %v237_v10, %v210_v34  ;;  %v116_v38 = vadd.f32 %v822_v58, %v115_v36 }
  0xc2   :  { %v150_v46 = vpop.f32.mrf.mxu1 }
  0xc3   :  { %v252_v40 = vmax.f32 %v238_v37, 0.0  ;;  %v144_v41 = vadd.f32 %v143_v13, %v116_v38 }
  0xc5   :  { %v839_v42 = vmax.f32 %v155_v39, %v252_v40  ;;  %v156_v50 = vmax.f32 %v144_v41, 0.0 }
  0xc6   :  { %v212_v44 = vpop.f32.mrf.mxu2 }
  0xc7   :  { %v213_v45 = vadd.f32 %v822_v58, %v212_v44 }
  0xc8   :  { %v117_v47 = vpop.f32.mrf.mxu0  ;;  %v247_v54 = vpop.f32.mrf.mxu3 }
  0xc9   :  { %v241_v48 = vadd.f32 %v240_v21, %v213_v45  ;;  %v118_v49 = vadd.f32 %v822_v58, %v117_v47 }
  0xca   :  { %v306_v57 = vpop.f32.mrf.mxu1 }
  0xcb   :  { %v253_v51 = vmax.f32 %v241_v48, 0.0  ;;  %v146_v52 = vadd.f32 %v145_v24, %v118_v49  ;;  %v307_v14 = vadd.f32 %v822_v58, %v306_v57 }
  0xcd   :  { %v843_v53 = vmax.f32 %v156_v50, %v253_v51  ;;  %v157_v62 = vmax.f32 %v146_v52, 0.0 }
  0xce   :  { %v214_v55 = vpop.f32.mrf.mxu2 }
  0xcf   :  { %v215_v56 = vadd.f32 %v822_v58, %v214_v55 }
  0xd0   :  { %v120_v59 = vpop.f32.mrf.mxu0  ;;  %v334_v2 = vpop.f32.mrf.mxu3 }
  0xd1   :  { %v243_v60 = vadd.f32 %v242_v32, %v215_v56  ;;  %v121_v61 = vadd.f32 %v822_v58, %v120_v59  ;;  %v335_v17 = vadd.f32 %v334_v2, %v307_v14 }
  0xd2   :  { %v308_v5 = vpop.f32.mrf.mxu1 }
  0xd3   :  { %v254_v63 = vmax.f32 %v243_v60, 0.0  ;;  %v149_v0 = vadd.f32 %v148_v35, %v121_v61  ;;  %v353_v22 = vmax.f32 %v335_v17, 0.0  ;;  %v309_v26 = vadd.f32 %v822_v58, %v308_v5 }
  0xd5   :  { %v847_v1 = vmax.f32 %v157_v62, %v254_v63  ;;  %v158_v8 = vmax.f32 %v149_v0, 0.0 }
  0xd6   :  { %v217_v3 = vpop.f32.mrf.mxu2 }
  0xd7   :  { %v218_v4 = vadd.f32 %v822_v58, %v217_v3 }
  0xd8   :  { %v122_v6 = vpop.f32.mrf.mxu0  ;;  %v336_v12 = vpop.f32.mrf.mxu3 }
  0xd9   :  { %v246_v7 = vadd.f32 %v245_v43, %v218_v4  ;;  %v337_v29 = vadd.f32 %v336_v12, %v309_v26 }
  0xda   :  { %v311_v15 = vpop.f32.mrf.mxu1 }
  0xdb   :  { %v255_v10 = vmax.f32 %v246_v7, 0.0  ;;  %v312_v35 = vadd.f32 %v822_v58, %v311_v15  ;;  %v354_v39 = vmax.f32 %v337_v29, 0.0 }
  0xdd   :  { %v850_v11 = vmax.f32 %v158_v8, %v255_v10 }
  0xde   :  { %v219_v13 = vpop.f32.mrf.mxu2 }
  0xe0   :  { %v403_v16 = vpop.f32.mrf.mxu0  ;;  %v339_v19 = vpop.f32.mrf.mxu3 }
  0xe1   :  { %v404_v18 = vadd.f32 %v822_v58, %v403_v16  ;;  %v340_v41 = vadd.f32 %v339_v19, %v312_v35 }
  0xe2   :  { %v313_v24 = vpop.f32.mrf.mxu1 }
  0xe3   :  { %v355_v47 = vmax.f32 %v340_v41, 0.0  ;;  %v314_v51 = vadd.f32 %v822_v58, %v313_v24 }
  0xe6   :  { %v431_v21 = vpop.f32.mrf.mxu2 }
  0xe7   :  { %v432_v23 = vadd.f32 %v431_v21, %v404_v18 }
  0xe8   :  { %v405_v25 = vpop.f32.mrf.mxu0  ;;  %v341_v33 = vpop.f32.mrf.mxu3 }
  0xe9   :  { %v450_v27 = vmax.f32 %v432_v23, 0.0  ;;  %v406_v32 = vadd.f32 %v822_v58, %v405_v25  ;;  %v342_v55 = vadd.f32 %v341_v33, %v314_v51 }
  0xea   :  { %v316_v37 = vpop.f32.mrf.mxu1 }
  0xeb   :  { %v457_v28 = vmax.f32 %v353_v22, %v450_v27  ;;  %v317_v60 = vadd.f32 %v822_v58, %v316_v37  ;;  %v356_v0 = vmax.f32 %v342_v55, 0.0 }
  0xed   :  { %v464_v30 = vmax.f32 %v827_v9, %v457_v28 }
  0xee   :  { %v433_v34 = vpop.f32.mrf.mxu2 }
  0xef   :  { %472 = vst.msk [vmem:[%s906_s6] sm:$0xff] %vm471_vm2, %v464_v30  ;;  %v434_v36 = vadd.f32 %v433_v34, %v406_v32 }
  0xf0   :  { %v408_v38 = vpop.f32.mrf.mxu0  ;;  %v344_v45 = vpop.f32.mrf.mxu3 }
  0xf1   :  { %v451_v40 = vmax.f32 %v434_v36, 0.0  ;;  %v409_v9 = vadd.f32 %v822_v58, %v408_v38  ;;  %v345_v3 = vadd.f32 %v344_v45, %v317_v60 }
  0xf2   :  { %v318_v49 = vpop.f32.mrf.mxu1 }
  0xf3   :  { %v458_v43 = vmax.f32 %v354_v39, %v451_v40  ;;  %v357_v8 = vmax.f32 %v345_v3, 0.0  ;;  %v319_v14 = vadd.f32 %v822_v58, %v318_v49 }
  0xf5   :  { %v465_v44 = vmax.f32 %v831_v20, %v458_v43 }
  0xf6   :  { %v436_v46 = vpop.f32.mrf.mxu2 }
  0xf7   :  { %473 = vst.msk [vmem:[%s906_s6 + $0x8] sm:$0xff] %vm471_vm2, %v465_v44  ;;  %v437_v48 = vadd.f32 %v436_v46, %v409_v9 }
  0xf8   :  { %v410_v50 = vpop.f32.mrf.mxu0  ;;  %v346_v57 = vpop.f32.mrf.mxu3 }
  0xf9   :  { %v452_v52 = vmax.f32 %v437_v48, 0.0  ;;  %v411_v20 = vadd.f32 %v822_v58, %v410_v50  ;;  %v347_v17 = vadd.f32 %v346_v57, %v319_v14 }
  0xfa   :  { %v321_v62 = vpop.f32.mrf.mxu1 }
  0xfb   :  { %v459_v54 = vmax.f32 %v355_v47, %v452_v52  ;;  %v322_v22 = vadd.f32 %v822_v58, %v321_v62  ;;  %v358_v25 = vmax.f32 %v347_v17, 0.0 }
  0xfd   :  { %v466_v56 = vmax.f32 %v835_v31, %v459_v54 }
  0xfe   :  { %v438_v59 = vpop.f32.mrf.mxu2 }
  0xff   :  { %474 = vst.msk [vmem:[%s906_s6 + $0x10] sm:$0xff] %vm471_vm2, %v466_v56  ;;  %v439_v61 = vadd.f32 %v438_v59, %v411_v20 }
 0x100   :  { %v413_v63 = vpop.f32.mrf.mxu0  ;;  %v349_v6 = vpop.f32.mrf.mxu3 }
 0x101   :  { %v453_v2 = vmax.f32 %v439_v61, 0.0  ;;  %v414_v31 = vadd.f32 %v822_v58, %v413_v63  ;;  %v350_v27 = vadd.f32 %v349_v6, %v322_v22 }
 0x102   :  { %v323_v12 = vpop.f32.mrf.mxu1 }
 0x103   :  { %v460_v4 = vmax.f32 %v356_v0, %v453_v2  ;;  %v359_v32 = vmax.f32 %v350_v27, 0.0 }
 0x105   :  { %v467_v5 = vmax.f32 %v839_v42, %v460_v4 }
 0x106   :  { %v441_v7 = vpop.f32.mrf.mxu2 }
 0x107   :  { %475 = vst.msk [vmem:[%s906_s6 + $0x18] sm:$0xff] %vm471_vm2, %v467_v5  ;;  %v442_v10 = vadd.f32 %v441_v7, %v414_v31 }
 0x108   :  { %v415_v13 = vpop.f32.mrf.mxu0  ;;  %v351_v19 = vpop.f32.mrf.mxu3 }
 0x109   :  { %v454_v15 = vmax.f32 %v442_v10, 0.0  ;;  %v416_v42 = vadd.f32 %v822_v58, %v415_v13 }
 0x10b   :  { %v461_v16 = vmax.f32 %v357_v8, %v454_v15 }
 0x10d   :  { %v468_v18 = vmax.f32 %v843_v53, %v461_v16 }
 0x10e   :  { %v443_v21 = vpop.f32.mrf.mxu2 }
 0x10f   :  { %476 = vst.msk [vmem:[%s906_s6 + $0x20] sm:$0xff] %vm471_vm2, %v468_v18  ;;  %v444_v23 = vadd.f32 %v443_v21, %v416_v42 }
 0x110   :  { %v418_v24 = vpop.f32.mrf.mxu0 }
 0x111   :  { %v455_v26 = vmax.f32 %v444_v23, 0.0  ;;  %v419_v29 = vadd.f32 %v822_v58, %v418_v24 }
 0x113   :  { %v462_v28 = vmax.f32 %v358_v25, %v455_v26 }
 0x115   :  { %v469_v53 = vmax.f32 %v847_v1, %v462_v28 }
 0x116   :  { %v446_v30 = vpop.f32.mrf.mxu2 }
 0x117   :  { %477 = vst.msk [vmem:[%s906_s6 + $0x28] sm:$0xff] %vm471_vm2, %v469_v53  ;;  %v447_v33 = vadd.f32 %v446_v30, %v419_v29 }
 0x118   :  { %v420_v34 = vpop.f32.mrf.mxu0 }
 0x119   :  { %v456_v35 = vmax.f32 %v447_v33, 0.0 }
 0x11b   :  { %v463_v36 = vmax.f32 %v359_v32, %v456_v35 }
 0x11d   :  { %v470_v37 = vmax.f32 %v850_v11, %v463_v36 }
 0x11e   :  { %v448_v38 = vpop.f32.mrf.mxu2 }
 0x11f   :  { %479 = vst.msk [vmem:[%s906_s6 + $0x30] sm:$0x3] %vm478_vm3, %v470_v37 }

</bundles_post_ra>
